<compile_context>
chip_gen: v5e
topology: v5e:2x2
jax: 0.10.0
libtpu: 0.0.40
codegen_flags: <defaults>
</compile_context>

<pallas_src>
import jax
import jax.numpy as jnp
import numpy as np
from jax.experimental import pallas as pl
from jax.experimental.pallas import tpu as pltpu

D = 4096            # 2**12, fixed by the 12-character Pauli strings / eye(4096)
NUM_MEAS = 5
SIGNS_PAD = 128     # pad measurement lane dim 5 -> 128 for lane-dense stores
PAULI_STRINGS = [
    "ZIIIIIIIIIII",
    "IZIIIIIIIIII",
    "IIZIIIIIIIII",
    "IIIZIIIIIIII",
    "IIIIZIIIIIII",
]
# The diagonal shortcut is valid only because every string is I/Z-only (an
# X/Y term would make H_m non-diagonal).  Fail loudly if that ever changes.
assert all(set(s) <= {"I", "Z"} for s in PAULI_STRINGS), \
    "diag shortcut requires I/Z-only Pauli strings"

_I = jnp.array([[1.0, 0.0], [0.0, 1.0]], dtype=jnp.float32)
_X = jnp.array([[0.0, 1.0], [1.0, 0.0]], dtype=jnp.float32)
_Z = jnp.array([[1.0, 0.0], [0.0, -1.0]], dtype=jnp.float32)
_TERM_TO_GATE = {"I": _I, "X": _X, "Z": _Z}


def get_pauli_unitary(s: str) -> jax.Array:
    """Dense Pauli matrix, exact same kron ordering as the PyTorch reference."""
    u = _TERM_TO_GATE[s[0]]
    for c in s[1:]:
        u = jnp.kron(_TERM_TO_GATE[c], u)
    return u


_I_DIAG = jnp.array([1.0, 1.0], dtype=jnp.float32)
_Z_DIAG = jnp.array([1.0, -1.0], dtype=jnp.float32)
_TERM_TO_DIAG = {"I": _I_DIAG, "Z": _Z_DIAG}


def get_pauli_diag(s: str) -> jax.Array:
    """diag(H) for an I/Z-only Pauli string (same kron ordering as above)."""
    d = _TERM_TO_DIAG[s[0]]
    for c in s[1:]:
        d = jnp.kron(_TERM_TO_DIAG[c], d)
    return d


# ------------------- fast path (Q == I): res = (x*x) @ signs -----------------
def _measure_kernel(x_ref, signs_ref, res_ref):
    x = x_ref[...]
    res_ref[...] = jnp.dot(x * x, signs_ref[...],
                           preferred_element_type=jnp.float32)


def measure_pallas(x, signs):
    """res[b, m] = sum_k x[b, k]^2 * signs[k, m].  Single grid step, ~2.3 MiB VMEM."""
    b, d = x.shape
    _, n_pad = signs.shape
    return pl.pallas_call(
        _measure_kernel,
        out_shape=jax.ShapeDtypeStruct((b, n_pad), jnp.float32),
        grid=(1,),
        in_specs=[
            pl.BlockSpec((b, d), lambda i: (0, 0)),
            pl.BlockSpec((d, n_pad), lambda i: (0, 0)),
        ],
        out_specs=pl.BlockSpec((b, n_pad), lambda i: (0, 0)),
    )(x, signs)


# ---------- general path (Q != I): fused weight-streaming kernel -------------
# Per column tile n:  o = x_bf16 @ Q_tile_bf16 (f32 acc on the MXU), then
# accumulate (o*o) @ signs[n*tn:(n+1)*tn, :] into a (B, 128) VMEM accumulator.
def _fused_kernel(x_ref, q_ref, signs_ref, res_ref, acc_ref):
    @pl.when(pl.program_id(0) == 0)
    def _():
        acc_ref[...] = jnp.zeros_like(acc_ref)

    # bf16 x bf16 single-pass MXU matmul; no f32 upcast of the Q tile in VMEM.
    o = jnp.dot(x_ref[...], q_ref[...], preferred_element_type=jnp.float32)
    acc_ref[...] += jnp.dot(o * o, signs_ref[...],
                            preferred_element_type=jnp.float32)

    @pl.when(pl.program_id(0) == pl.num_programs(0) - 1)
    def _():
        res_ref[...] = acc_ref[...]


def fused_measure_pallas(x_bf16, q_blocks_bf16, signs, *, tn=1024):
    """res = ((x @ Q)**2) @ signs, fused into one pallas_call.

    q_blocks_bf16: (N // tn, K, tn) contiguous bf16 column tiles of Q.
    """
    b, k_dim = x_bf16.shape
    n_blocks, k2, tn2 = q_blocks_bf16.shape
    _, n_pad = signs.shape
    assert k2 == k_dim and tn2 == tn
    return pl.pallas_call(
        _fused_kernel,
        out_shape=jax.ShapeDtypeStruct((b, n_pad), jnp.float32),
        grid_spec=pltpu.PrefetchScalarGridSpec(
            num_scalar_prefetch=0,
            grid=(n_blocks,),
            in_specs=[
                pl.BlockSpec((b, k_dim), lambda n: (0, 0)),            # x resident
                pl.BlockSpec((None, k_dim, tn), lambda n: (n, 0, 0)),  # packed Q tile
                pl.BlockSpec((tn, n_pad), lambda n: (n, 0)),           # matching sign rows
            ],
            out_specs=pl.BlockSpec((b, n_pad), lambda n: (0, 0)),
            scratch_shapes=[pltpu.VMEM((b, n_pad), jnp.float32)],
        ),
        # Column-tile axis feeds an accumulator -> it is a reduction axis.
        # TODO(synk): a per-step-partials variant would recover v7x megacore
        # sharding; int8/fp8 Q would halve the HBM stream again if this
        # fallback ever runs with a non-trivial U_holder.
        compiler_params=pltpu.CompilerParams(
            dimension_semantics=("arbitrary",),
            vmem_limit_bytes=48 * 1024 * 1024),   # ~17 MiB used; fits v7x 64 MiB
    )(x_bf16, q_blocks_bf16, signs)


# ---------------------------------- module -----------------------------------
class MLP0:
    def __init__(self, *, tn=1024):
        self.tn = tn
        # Deterministic init, same as torch: U_holder = eye(4096).
        self.U_holder = jnp.eye(D, dtype=jnp.float32)
        # TODO(synk): torch.linalg.qr has no Pallas primitive; it is computed
        # once in plain JAX at init.  U_holder is a fixed parameter here, so Q
        # never changes between forwards and hoisting keeps semantics identical.
        q, _ = jnp.linalg.qr(self.U_holder, mode="complete")            # (D, D)
        # QR(eye) is exactly the identity -> out = x @ Q == x.  Detected (not
        # assumed): a non-trivial U_holder would take the general path below.
        self.q_is_identity = bool(jnp.array_equal(q, jnp.eye(D, dtype=q.dtype)))
        # General-path weights: bf16 (bit-exact for QR(eye)'s {0, +-1} entries),
        # pre-packed as contiguous (N/tn, K, tn) column tiles.
        self.q_blocks_bf16 = jnp.swapaxes(
            q.reshape(D, D // tn, tn), 0, 1).astype(jnp.bfloat16)
        # (D, 5) +-1 sign table (replaces five dense 64 MiB H_m), padded to 128
        # lanes for lane-dense, unmasked stores.
        meas_diag = jnp.stack(
            [get_pauli_diag(s) for s in PAULI_STRINGS], axis=-1)         # (D, 5)
        self.signs = (jnp.zeros((D, SIGNS_PAD), jnp.float32)
                      .at[:, :NUM_MEAS].set(meas_diag))

    def forward(self, x):
        xr = jnp.real(x).squeeze(-1).astype(jnp.float32)                 # (B, D)
        if self.q_is_identity:
            res = measure_pallas(xr, self.signs)                         # (B, 128)
        else:
            res = fused_measure_pallas(xr.astype(jnp.bfloat16),
                                       self.q_blocks_bf16, self.signs,
                                       tn=self.tn)                       # (B, 128)
        return res[:, :NUM_MEAS]                                         # (B, 5)


if __name__ == "__main__":
    B = 8
    key = jax.random.PRNGKey(0)
    kr, ki = jax.random.split(key)
    x = (jax.random.normal(kr, (B, D, 1), dtype=jnp.float32)
         + 1j * jax.random.normal(ki, (B, D, 1), dtype=jnp.float32)).astype(jnp.complex64)

    model = MLP0()
    y = jax.block_until_ready(model.forward(x))
    assert y.shape == (B, NUM_MEAS) and y.dtype == jnp.float32

    # Plain-JAX reference of the exact PyTorch forward (per-forward QR, dense H).
    xr = jnp.real(x).squeeze(-1)
    q_ref, _ = jnp.linalg.qr(jnp.eye(D, dtype=jnp.float32), mode="complete")
    out_ref = xr @ q_ref
    ref = jnp.stack(
        [jnp.diagonal(out_ref @ get_pauli_unitary(s) @ out_ref.T)
         for s in PAULI_STRINGS], axis=-1)
    np.testing.assert_allclose(np.asarray(y), np.asarray(ref), rtol=5e-3, atol=5e-2)

    # Also exercise the general (non-identity-Q) fused fallback kernel once,
    # checked against a bf16-input reference (Q's {0,+-1} entries are exact in bf16).
    xr_bf16 = xr.astype(jnp.bfloat16)
    y_gen = jax.block_until_ready(
        fused_measure_pallas(xr_bf16, model.q_blocks_bf16, model.signs,
                             tn=model.tn))[:, :NUM_MEAS]
    out_gen = xr_bf16.astype(jnp.float32) @ q_ref
    ref_gen = (out_gen * out_gen) @ jnp.stack(
        [get_pauli_diag(s) for s in PAULI_STRINGS], axis=-1)
    np.testing.assert_allclose(np.asarray(y_gen), np.asarray(ref_gen),
                               rtol=1e-3, atol=1e-2)

    print("KERNEL_OK")
</pallas_src>

<mosaic_0001>
module attributes {stable_mosaic.version = 11 : i64} {
  func.func @_measure_kernel(%arg0: i32, %arg1: memref<8x4096xf32, #tpu.memory_space<vmem>>, %arg2: memref<4096x128xf32, #tpu.memory_space<vmem>>, %arg3: memref<8x128xf32, #tpu.memory_space<vmem>>) attributes {dimension_semantics = [#tpu.dimension_semantics<arbitrary>], iteration_bounds = array<i64: 1>, scalar_prefetch = 0 : i64, scratch_operands = 0 : i64, tpu.core_type = #tpu.core_type<tc>, window_params = [{pipeline_mode = #tpu.pipeline_mode<synchronous>, transform_indices = @transform_0, window_bounds = array<i64: 8, 4096>}, {pipeline_mode = #tpu.pipeline_mode<synchronous>, transform_indices = @transform_1, window_bounds = array<i64: 4096, 128>}, {pipeline_mode = #tpu.pipeline_mode<synchronous>, transform_indices = @transform_2, window_bounds = array<i64: 8, 128>}]} {
    %c0 = arith.constant 0 : index
    %c0_0 = arith.constant 0 : index
    %0 = vector.load %arg1[%c0, %c0_0] : memref<8x4096xf32, #tpu.memory_space<vmem>>, vector<8x4096xf32>
    %1 = arith.mulf %0, %0 : vector<8x4096xf32>
    %c0_1 = arith.constant 0 : index
    %c0_2 = arith.constant 0 : index
    %2 = vector.load %arg2[%c0_1, %c0_2] : memref<4096x128xf32, #tpu.memory_space<vmem>>, vector<4096x128xf32>
    %cst = arith.constant dense<0.000000e+00> : vector<8x128xf32>
    %3 = tpu.matmul %1, %2, %cst {dimension_numbers = #tpu.dot_dimension_numbers<[1], [0], [0], [1], [0, 0, 1, 1], [], []>} : vector<8x4096xf32>, vector<4096x128xf32>, vector<8x128xf32> -> vector<8x128xf32>
    %c0_3 = arith.constant 0 : index
    %c0_4 = arith.constant 0 : index
    %4 = vector.load %arg3[%c0_3, %c0_4] : memref<8x128xf32, #tpu.memory_space<vmem>>, vector<8x128xf32>
    tpu.vector_store %arg3[%c0_3, %c0_4], %3 {strides = array<i32>} : memref<8x128xf32, #tpu.memory_space<vmem>>, vector<8x128xf32>,
    return
  }
  func.func @transform_0(%arg0: i32) -> (i32, i32) {
    %c0_i32 = arith.constant 0 : i32
    %c0_i32_0 = arith.constant 0 : i32
    %c0_i32_1 = arith.constant 0 : i32
    return %c0_i32, %c0_i32_0 : i32, i32
  }
  func.func @transform_1(%arg0: i32) -> (i32, i32) {
    %c0_i32 = arith.constant 0 : i32
    %c0_i32_0 = arith.constant 0 : i32
    %c0_i32_1 = arith.constant 0 : i32
    return %c0_i32, %c0_i32_0 : i32, i32
  }
  func.func @transform_2(%arg0: i32) -> (i32, i32) {
    %c0_i32 = arith.constant 0 : i32
    %c0_i32_0 = arith.constant 0 : i32
    %c0_i32_1 = arith.constant 0 : i32
    return %c0_i32, %c0_i32_0 : i32, i32
  }
}

</mosaic_0001>

<bundles_post_ra>
// kernel: tpu_custom_call.1
= control target key start
LH: loop header
LB: loop body
LE: loop exit
PB: predicated region body
PF: predicated region fallthrough
CT: control target
= control target key end

     0   :  { %7 = vsyncpa [#allocation3], 0  ;;  %s1389_s0 = inlined_call_operand.hbm [shape: f32[8,4096], index: 0, kind: input, shape index: {}]   ;;  %s1390_s1 = inlined_call_operand.hbm [shape: f32[4096,128], index: 1, kind: input, shape index: {}]   ;;  %s1391_s2 = inlined_call_operand.hbm [shape: f32[8,128], index: 2, kind: output, shape index: {}]  }
   0x1   :  { %8 = vsyncpa [#allocation6], 0 }
   0x2   :  { %9 = vsyncpa [#allocation4], 0  ;;  %s15_s11 = sshll.u32 %s1389_s0, 4  ;;  %s1360_s12 = smov [#allocation2]   ;;  %s16_s11 = int_to_ptr.hbm [resolvable:$true] %s15_s11 }
   0x3   :  { %s17_s13 = sshll.u32 %s1360_s12, 4  ;;  %s25_s16 = sshll.u32 %s1390_s1, 4  ;;  %s18_s13 = int_to_ptr.vmem [resolvable:$true] %s17_s13  ;;  %s26_s16 = int_to_ptr.hbm [resolvable:$true] %s25_s16 }
   0x4   :  { %20 = dma.hbm_to_vmem [thread:$0]  %s16_s11, 4096, %s18_s13, [#allocation3]  }
   0x5   :  { %s1361_s17 = smov [#allocation5]   ;;  %s1362_s19 = smov 128  }
   0x6   :  { %s27_s18 = sshll.u32 %s1361_s17, 4  ;;  %s1363_s20 = smov 8   ;;  %s28_s18 = int_to_ptr.vmem [resolvable:$true] %s27_s18 }
   0x7   :  { %33 = dma.hbm_to_vmem [thread:$0]  %s26_s16, 65536, %s28_s18, [#allocation6], %s1362_s19, %s1362_s19, %s1363_s20  }
   0x8   :  { %1354 = dma.done.wait [#allocation3], 4096  }
   0x9   :  { %1355 = vsyncadd [#allocation3], 4294963200 }
   0xa   :  { %1356 = dma.done.wait [#allocation6], 65536  }
   0xb   :  { %1357 = vsyncadd [#allocation6], 4294901760  ;;  %v121_v0 = vld [vmem:[#allocation5 + $0x78] sm:$0xff]  ;;  %v120_v2 = vld [vmem:[#allocation5 + $0x70] sm:$0xff]  ;;  %s1364_s0 = smov [#allocation7]   ;;  %s1266_s23 = sshll.u32 %s1391_s2, 4  ;;  %s1267_s23 = int_to_ptr.hbm [resolvable:$true] %s1266_s23 }
   0xc   :  { %v153_v1 = vld [vmem:[#allocation5 + $0x178] sm:$0xff]  ;;  %618 = vmatpush.msra.mxu0 %v121_v0  ;;  %v152_v4 = vld [vmem:[#allocation5 + $0x170] sm:$0xff]  ;;  %v119_v6 = vld [vmem:[#allocation5 + $0x68] sm:$0xff]  ;;  %s1264_s1 = sshll.u32 %s1364_s0, 4  ;;  %s1265_s1 = int_to_ptr.vmem [resolvable:$true] %s1264_s1 }
   0xd   :  { %658 = vmatpush.msra.mxu2 %v153_v1  ;;  %v137_v3 = vld [vmem:[#allocation5 + $0xf8] sm:$0xff]  ;;  %v136_v7 = vld [vmem:[#allocation5 + $0xf0] sm:$0xff]  ;;  %v151_v8 = vld [vmem:[#allocation5 + $0x168] sm:$0xff] }
   0xe   :  { %v169_v5 = vld [vmem:[#allocation5 + $0x1f8] sm:$0xff]  ;;  %638 = vmatpush.msra.mxu1 %v137_v3  ;;  %619 = vmatpush.msra.mxu0 %v120_v2  ;;  %v168_v9 = vld [vmem:[#allocation5 + $0x1f0] sm:$0xff]  ;;  %v135_v10 = vld [vmem:[#allocation5 + $0xe8] sm:$0xff] }
   0xf   :  { %678 = vmatpush.msra.mxu3 %v169_v5  ;;  %659 = vmatpush.msra.mxu2 %v152_v4  ;;  %v118_v11 = vld [vmem:[#allocation5 + $0x60] sm:$0xff]  ;;  %v167_v13 = vld [vmem:[#allocation5 + $0x1e8] sm:$0xff]  ;;  %v117_v16 = vld [vmem:[#allocation5 + $0x58] sm:$0xff] }
  0x10   :  { %639 = vmatpush.msra.mxu1 %v136_v7  ;;  %v150_v12 = vld [vmem:[#allocation5 + $0x160] sm:$0xff]  ;;  %620 = vmatpush.msra.mxu0 %v119_v6  ;;  %v149_v17 = vld [vmem:[#allocation5 + $0x158] sm:$0xff]  ;;  %v116_v20 = vld [vmem:[#allocation5 + $0x50] sm:$0xff] }
  0x11   :  { %679 = vmatpush.msra.mxu3 %v168_v9  ;;  %660 = vmatpush.msra.mxu2 %v151_v8  ;;  %v134_v14 = vld [vmem:[#allocation5 + $0xe0] sm:$0xff]  ;;  %v133_v18 = vld [vmem:[#allocation5 + $0xd8] sm:$0xff]  ;;  %v148_v21 = vld [vmem:[#allocation5 + $0x150] sm:$0xff] }
  0x12   :  { %v166_v15 = vld [vmem:[#allocation5 + $0x1e0] sm:$0xff]  ;;  %640 = vmatpush.msra.mxu1 %v135_v10  ;;  %621 = vmatpush.msra.mxu0 %v118_v11  ;;  %v165_v19 = vld [vmem:[#allocation5 + $0x1d8] sm:$0xff]  ;;  %v132_v22 = vld [vmem:[#allocation5 + $0xd0] sm:$0xff] }
  0x13   :  { %680 = vmatpush.msra.mxu3 %v167_v13  ;;  %661 = vmatpush.msra.mxu2 %v150_v12  ;;  %v164_v23 = vld [vmem:[#allocation5 + $0x1d0] sm:$0xff]  ;;  %v115_v24 = vld [vmem:[#allocation5 + $0x48] sm:$0xff]  ;;  %v114_v28 = vld [vmem:[#allocation5 + $0x40] sm:$0xff] }
  0x14   :  { %641 = vmatpush.msra.mxu1 %v134_v14  ;;  %622 = vmatpush.msra.mxu0 %v117_v16  ;;  %v147_v25 = vld [vmem:[#allocation5 + $0x148] sm:$0xff]  ;;  %v146_v29 = vld [vmem:[#allocation5 + $0x140] sm:$0xff]  ;;  %v113_v32 = vld [vmem:[#allocation5 + $0x38] sm:$0xff] }
  0x15   :  { %681 = vmatpush.msra.mxu3 %v166_v15  ;;  %662 = vmatpush.msra.mxu2 %v149_v17  ;;  %v131_v26 = vld [vmem:[#allocation5 + $0xc8] sm:$0xff]  ;;  %v130_v30 = vld [vmem:[#allocation5 + $0xc0] sm:$0xff]  ;;  %v145_v33 = vld [vmem:[#allocation5 + $0x138] sm:$0xff] }
  0x16   :  { %642 = vmatpush.msra.mxu1 %v133_v18  ;;  %623 = vmatpush.msra.mxu0 %v116_v20  ;;  %v163_v27 = vld [vmem:[#allocation5 + $0x1c8] sm:$0xff]  ;;  %v162_v31 = vld [vmem:[#allocation5 + $0x1c0] sm:$0xff]  ;;  %v129_v34 = vld [vmem:[#allocation5 + $0xb8] sm:$0xff] }
  0x17   :  { %682 = vmatpush.msra.mxu3 %v165_v19  ;;  %663 = vmatpush.msra.mxu2 %v148_v21  ;;  %v161_v35 = vld [vmem:[#allocation5 + $0x1b8] sm:$0xff]  ;;  %v112_v36 = vld [vmem:[#allocation5 + $0x30] sm:$0xff]  ;;  %v111_v40 = vld [vmem:[#allocation5 + $0x28] sm:$0xff] }
  0x18   :  { %643 = vmatpush.msra.mxu1 %v132_v22  ;;  %624 = vmatpush.msra.mxu0 %v115_v24  ;;  %v144_v37 = vld [vmem:[#allocation5 + $0x130] sm:$0xff]  ;;  %v143_v41 = vld [vmem:[#allocation5 + $0x128] sm:$0xff]  ;;  %v110_v44 = vld [vmem:[#allocation5 + $0x20] sm:$0xff] }
  0x19   :  { %683 = vmatpush.msra.mxu3 %v164_v23  ;;  %664 = vmatpush.msra.mxu2 %v147_v25  ;;  %v128_v38 = vld [vmem:[#allocation5 + $0xb0] sm:$0xff]  ;;  %v127_v42 = vld [vmem:[#allocation5 + $0xa8] sm:$0xff]  ;;  %v142_v45 = vld [vmem:[#allocation5 + $0x120] sm:$0xff] }
  0x1a   :  { %644 = vmatpush.msra.mxu1 %v131_v26  ;;  %625 = vmatpush.msra.mxu0 %v114_v28  ;;  %v160_v39 = vld [vmem:[#allocation5 + $0x1b0] sm:$0xff]  ;;  %v159_v43 = vld [vmem:[#allocation5 + $0x1a8] sm:$0xff]  ;;  %v126_v46 = vld [vmem:[#allocation5 + $0xa0] sm:$0xff] }
  0x1b   :  { %684 = vmatpush.msra.mxu3 %v163_v27  ;;  %665 = vmatpush.msra.mxu2 %v146_v29  ;;  %v158_v47 = vld [vmem:[#allocation5 + $0x1a0] sm:$0xff]  ;;  %v109_v48 = vld [vmem:[#allocation5 + $0x18] sm:$0xff]  ;;  %v108_v52 = vld [vmem:[#allocation5 + $0x10] sm:$0xff] }
  0x1c   :  { %645 = vmatpush.msra.mxu1 %v130_v30  ;;  %626 = vmatpush.msra.mxu0 %v113_v32  ;;  %v141_v49 = vld [vmem:[#allocation5 + $0x118] sm:$0xff]  ;;  %v140_v53 = vld [vmem:[#allocation5 + $0x110] sm:$0xff]  ;;  %v107_v56 = vld [vmem:[#allocation5 + $0x8] sm:$0xff] }
  0x1d   :  { %685 = vmatpush.msra.mxu3 %v162_v31  ;;  %666 = vmatpush.msra.mxu2 %v145_v33  ;;  %v125_v50 = vld [vmem:[#allocation5 + $0x98] sm:$0xff]  ;;  %v124_v54 = vld [vmem:[#allocation5 + $0x90] sm:$0xff]  ;;  %v139_v57 = vld [vmem:[#allocation5 + $0x108] sm:$0xff] }
  0x1e   :  { %646 = vmatpush.msra.mxu1 %v129_v34  ;;  %627 = vmatpush.msra.mxu0 %v112_v36  ;;  %v157_v51 = vld [vmem:[#allocation5 + $0x198] sm:$0xff]  ;;  %v156_v55 = vld [vmem:[#allocation5 + $0x190] sm:$0xff]  ;;  %v123_v58 = vld [vmem:[#allocation5 + $0x88] sm:$0xff] }
  0x1f   :  { %686 = vmatpush.msra.mxu3 %v161_v35  ;;  %667 = vmatpush.msra.mxu2 %v144_v37  ;;  %v155_v59 = vld [vmem:[#allocation5 + $0x188] sm:$0xff]  ;;  %v106_v60 = vld [vmem:[#allocation5] sm:$0xff]  ;;  %v185_v62 = vld [vmem:[#allocation5 + $0x278] sm:$0xff] }
  0x20   :  { %647 = vmatpush.msra.mxu1 %v128_v38  ;;  %628 = vmatpush.msra.mxu0 %v111_v40  ;;  %v138_v61 = vld [vmem:[#allocation5 + $0x100] sm:$0xff]  ;;  %v217_v63 = vld [vmem:[#allocation5 + $0x378] sm:$0xff]  ;;  %v184_v2 = vld [vmem:[#allocation5 + $0x270] sm:$0xff] }
  0x21   :  { %687 = vmatpush.msra.mxu3 %v160_v39  ;;  %668 = vmatpush.msra.mxu2 %v143_v41  ;;  %v122_v0 = vld [vmem:[#allocation5 + $0x80] sm:$0xff]  ;;  %v201_v3 = vld [vmem:[#allocation5 + $0x2f8] sm:$0xff]  ;;  %v216_v4 = vld [vmem:[#allocation5 + $0x370] sm:$0xff] }
  0x22   :  { %648 = vmatpush.msra.mxu1 %v127_v42  ;;  %629 = vmatpush.msra.mxu0 %v110_v44  ;;  %v154_v1 = vld [vmem:[#allocation5 + $0x180] sm:$0xff]  ;;  %v233_v5 = vld [vmem:[#allocation5 + $0x3f8] sm:$0xff]  ;;  %v183_v6 = vld [vmem:[#allocation5 + $0x268] sm:$0xff] }
  0x23   :  { %688 = vmatpush.msra.mxu3 %v159_v43  ;;  %669 = vmatpush.msra.mxu2 %v142_v45  ;;  %v200_v7 = vld [vmem:[#allocation5 + $0x2f0] sm:$0xff]  ;;  %v215_v8 = vld [vmem:[#allocation5 + $0x368] sm:$0xff]  ;;  %v182_v10 = vld [vmem:[#allocation5 + $0x260] sm:$0xff] }
  0x24   :  { %649 = vmatpush.msra.mxu1 %v126_v46  ;;  %630 = vmatpush.msra.mxu0 %v109_v48  ;;  %v232_v9 = vld [vmem:[#allocation5 + $0x3f0] sm:$0xff]  ;;  %v199_v11 = vld [vmem:[#allocation5 + $0x2e8] sm:$0xff]  ;;  %v214_v12 = vld [vmem:[#allocation5 + $0x360] sm:$0xff] }
  0x25   :  { %689 = vmatpush.msra.mxu3 %v158_v47  ;;  %670 = vmatpush.msra.mxu2 %v141_v49  ;;  %v231_v13 = vld [vmem:[#allocation5 + $0x3e8] sm:$0xff]  ;;  %v181_v14 = vld [vmem:[#allocation5 + $0x258] sm:$0xff]  ;;  %v198_v15 = vld [vmem:[#allocation5 + $0x2e0] sm:$0xff] }
  0x26   :  { %650 = vmatpush.msra.mxu1 %v125_v50  ;;  %631 = vmatpush.msra.mxu0 %v108_v52  ;;  %v213_v16 = vld [vmem:[#allocation5 + $0x358] sm:$0xff]  ;;  %v230_v17 = vld [vmem:[#allocation5 + $0x3e0] sm:$0xff]  ;;  %v180_v18 = vld [vmem:[#allocation5 + $0x250] sm:$0xff] }
  0x27   :  { %690 = vmatpush.msra.mxu3 %v157_v51  ;;  %671 = vmatpush.msra.mxu2 %v140_v53  ;;  %v197_v19 = vld [vmem:[#allocation5 + $0x2d8] sm:$0xff]  ;;  %v212_v20 = vld [vmem:[#allocation5 + $0x350] sm:$0xff]  ;;  %v179_v22 = vld [vmem:[#allocation5 + $0x248] sm:$0xff] }
  0x28   :  { %651 = vmatpush.msra.mxu1 %v124_v54  ;;  %632 = vmatpush.msra.mxu0 %v107_v56  ;;  %v229_v21 = vld [vmem:[#allocation5 + $0x3d8] sm:$0xff]  ;;  %v196_v23 = vld [vmem:[#allocation5 + $0x2d0] sm:$0xff]  ;;  %v211_v24 = vld [vmem:[#allocation5 + $0x348] sm:$0xff] }
  0x29   :  { %691 = vmatpush.msra.mxu3 %v156_v55  ;;  %672 = vmatpush.msra.mxu2 %v139_v57  ;;  %v228_v25 = vld [vmem:[#allocation5 + $0x3d0] sm:$0xff]  ;;  %v178_v26 = vld [vmem:[#allocation5 + $0x240] sm:$0xff]  ;;  %v195_v27 = vld [vmem:[#allocation5 + $0x2c8] sm:$0xff] }
  0x2a   :  { %652 = vmatpush.msra.mxu1 %v123_v58  ;;  %633 = vmatpush.msra.mxu0 %v106_v60  ;;  %v210_v28 = vld [vmem:[#allocation5 + $0x340] sm:$0xff]  ;;  %v227_v29 = vld [vmem:[#allocation5 + $0x3c8] sm:$0xff]  ;;  %v177_v30 = vld [vmem:[#allocation5 + $0x238] sm:$0xff] }
  0x2b   :  { %692 = vmatpush.msra.mxu3 %v155_v59  ;;  %673 = vmatpush.msra.mxu2 %v138_v61  ;;  %v194_v31 = vld [vmem:[#allocation5 + $0x2c0] sm:$0xff]  ;;  %v209_v32 = vld [vmem:[#allocation5 + $0x338] sm:$0xff]  ;;  %v176_v34 = vld [vmem:[#allocation5 + $0x230] sm:$0xff] }
  0x2c   :  { %698 = vmatpush.msrb.mxu0 %v185_v62  ;;  %653 = vmatpush.msra.mxu1 %v122_v0  ;;  %v226_v33 = vld [vmem:[#allocation5 + $0x3c0] sm:$0xff]  ;;  %v193_v35 = vld [vmem:[#allocation5 + $0x2b8] sm:$0xff]  ;;  %v208_v36 = vld [vmem:[#allocation5 + $0x330] sm:$0xff] }
  0x2d   :  { %738 = vmatpush.msrb.mxu2 %v217_v63  ;;  %693 = vmatpush.msra.mxu3 %v154_v1  ;;  %v225_v37 = vld [vmem:[#allocation5 + $0x3b8] sm:$0xff]  ;;  %v175_v38 = vld [vmem:[#allocation5 + $0x228] sm:$0xff]  ;;  %v192_v39 = vld [vmem:[#allocation5 + $0x2b0] sm:$0xff] }
  0x2e   :  { %699 = vmatpush.msrb.mxu0 %v184_v2  ;;  %718 = vmatpush.msrb.mxu1 %v201_v3  ;;  %v207_v40 = vld [vmem:[#allocation5 + $0x328] sm:$0xff]  ;;  %v224_v41 = vld [vmem:[#allocation5 + $0x3b0] sm:$0xff]  ;;  %v174_v42 = vld [vmem:[#allocation5 + $0x220] sm:$0xff] }
  0x2f   :  { %739 = vmatpush.msrb.mxu2 %v216_v4  ;;  %758 = vmatpush.msrb.mxu3 %v233_v5  ;;  %v191_v43 = vld [vmem:[#allocation5 + $0x2a8] sm:$0xff]  ;;  %v206_v44 = vld [vmem:[#allocation5 + $0x320] sm:$0xff]  ;;  %v173_v46 = vld [vmem:[#allocation5 + $0x218] sm:$0xff] }
  0x30   :  { %700 = vmatpush.msrb.mxu0 %v183_v6  ;;  %719 = vmatpush.msrb.mxu1 %v200_v7  ;;  %v223_v45 = vld [vmem:[#allocation5 + $0x3a8] sm:$0xff]  ;;  %v190_v47 = vld [vmem:[#allocation5 + $0x2a0] sm:$0xff]  ;;  %v205_v48 = vld [vmem:[#allocation5 + $0x318] sm:$0xff] }
  0x31   :  { %740 = vmatpush.msrb.mxu2 %v215_v8  ;;  %759 = vmatpush.msrb.mxu3 %v232_v9  ;;  %v222_v49 = vld [vmem:[#allocation5 + $0x3a0] sm:$0xff]  ;;  %v172_v50 = vld [vmem:[#allocation5 + $0x210] sm:$0xff]  ;;  %v189_v51 = vld [vmem:[#allocation5 + $0x298] sm:$0xff] }
  0x32   :  { %701 = vmatpush.msrb.mxu0 %v182_v10  ;;  %720 = vmatpush.msrb.mxu1 %v199_v11  ;;  %v44_v52 = vld [vmem:[#allocation2 + $0x10] sm:$0xff]  ;;  %v221_v54 = vld [vmem:[#allocation5 + $0x398] sm:$0xff]  ;;  %v171_v55 = vld [vmem:[#allocation5 + $0x208] sm:$0xff] }
  0x33   :  { %741 = vmatpush.msrb.mxu2 %v214_v12  ;;  %760 = vmatpush.msrb.mxu3 %v231_v13  ;;  %v204_v53 = vld [vmem:[#allocation5 + $0x310] sm:$0xff]  ;;  %v42_v57 = vld [vmem:[#allocation2] sm:$0xff]  ;;  %v203_v58 = vld [vmem:[#allocation5 + $0x308] sm:$0xff]  ;;  %v76_v60 = vmul.f32 %v44_v52, %v44_v52 }
  0x34   :  { %702 = vmatpush.msrb.mxu0 %v181_v14  ;;  %721 = vmatpush.msrb.mxu1 %v198_v15  ;;  %v188_v56 = vld [vmem:[#allocation5 + $0x290] sm:$0xff]  ;;  %v45_v61 = vld [vmem:[#allocation2 + $0x18] sm:$0xff]  ;;  %v170_v62 = vld [vmem:[#allocation5 + $0x200] sm:$0xff]  ;;  %v74_v1 = vmul.f32 %v42_v57, %v42_v57 }
  0x35   :  { %742 = vmatpush.msrb.mxu2 %v213_v16  ;;  %761 = vmatpush.msrb.mxu3 %v230_v17  ;;  %v220_v59 = vld [vmem:[#allocation5 + $0x390] sm:$0xff]  ;;  %v187_v63 = vld [vmem:[#allocation5 + $0x288] sm:$0xff]  ;;  %v202_v0 = vld [vmem:[#allocation5 + $0x300] sm:$0xff]  ;;  %v77_v4 = vmul.f32 %v45_v61, %v45_v61 }
  0x36   :  { %703 = vmatpush.msrb.mxu0 %v180_v18  ;;  %722 = vmatpush.msrb.mxu1 %v197_v19  ;;  %v43_v2 = vld [vmem:[#allocation2 + $0x8] sm:$0xff]  ;;  %v249_v5 = vld [vmem:[#allocation5 + $0x478] sm:$0xff]  ;;  %v186_v7 = vld [vmem:[#allocation5 + $0x280] sm:$0xff] }
  0x37   :  { %743 = vmatpush.msrb.mxu2 %v212_v20  ;;  %762 = vmatpush.msrb.mxu3 %v229_v21  ;;  %v219_v3 = vld [vmem:[#allocation5 + $0x388] sm:$0xff]  ;;  %v281_v6 = vld [vmem:[#allocation5 + $0x578] sm:$0xff]  ;;  %v75_v8 = vmul.f32 %v43_v2, %v43_v2  ;;  %v218_v9 = vld [vmem:[#allocation5 + $0x380] sm:$0xff] }
  0x38   :  { %704 = vmatpush.msrb.mxu0 %v179_v22  ;;  %723 = vmatpush.msrb.mxu1 %v196_v23  ;;  %v248_v10 = vld [vmem:[#allocation5 + $0x470] sm:$0xff]  ;;  %v265_v11 = vld [vmem:[#allocation5 + $0x4f8] sm:$0xff]  ;;  %v247_v15 = vld [vmem:[#allocation5 + $0x468] sm:$0xff] }
  0x39   :  { %744 = vmatpush.msrb.mxu2 %v211_v24  ;;  %763 = vmatpush.msrb.mxu3 %v228_v25  ;;  %v48_v12 = vld [vmem:[#allocation2 + $0x30] sm:$0xff]  ;;  %v297_v14 = vld [vmem:[#allocation5 + $0x5f8] sm:$0xff]  ;;  %v46_v17 = vld [vmem:[#allocation2 + $0x20] sm:$0xff] }
  0x3a   :  { %705 = vmatpush.msrb.mxu0 %v178_v26  ;;  %724 = vmatpush.msrb.mxu1 %v195_v27  ;;  %v280_v13 = vld [vmem:[#allocation5 + $0x570] sm:$0xff]  ;;  %v279_v18 = vld [vmem:[#allocation5 + $0x568] sm:$0xff]  ;;  %v80_v20 = vmul.f32 %v48_v12, %v48_v12  ;;  %v49_v21 = vld [vmem:[#allocation2 + $0x38] sm:$0xff]  ;;  %v78_v25 = vmul.f32 %v46_v17, %v46_v17 }
  0x3b   :  { %745 = vmatpush.msrb.mxu2 %v210_v28  ;;  %764 = vmatpush.msrb.mxu3 %v227_v29  ;;  %v264_v16 = vld [vmem:[#allocation5 + $0x4f0] sm:$0xff]  ;;  %v246_v22 = vld [vmem:[#allocation5 + $0x460] sm:$0xff]  ;;  %v263_v23 = vld [vmem:[#allocation5 + $0x4e8] sm:$0xff]  ;;  %v81_v28 = vmul.f32 %v49_v21, %v49_v21 }
  0x3c   :  { %706 = vmatpush.msrb.mxu0 %v177_v30  ;;  %725 = vmatpush.msrb.mxu1 %v194_v31  ;;  %v296_v19 = vld [vmem:[#allocation5 + $0x5f0] sm:$0xff]  ;;  %v278_v24 = vld [vmem:[#allocation5 + $0x560] sm:$0xff]  ;;  %v47_v26 = vld [vmem:[#allocation2 + $0x28] sm:$0xff] }
  0x3d   :  { %746 = vmatpush.msrb.mxu2 %v209_v32  ;;  %765 = vmatpush.msrb.mxu3 %v226_v33  ;;  %v295_v27 = vld [vmem:[#allocation5 + $0x5e8] sm:$0xff]  ;;  %v245_v29 = vld [vmem:[#allocation5 + $0x458] sm:$0xff]  ;;  %v262_v30 = vld [vmem:[#allocation5 + $0x4e0] sm:$0xff]  ;;  %v79_v32 = vmul.f32 %v47_v26, %v47_v26 }
  0x3e   :  { %707 = vmatpush.msrb.mxu0 %v176_v34  ;;  %726 = vmatpush.msrb.mxu1 %v193_v35  ;;  %v277_v31 = vld [vmem:[#allocation5 + $0x558] sm:$0xff]  ;;  %v294_v33 = vld [vmem:[#allocation5 + $0x5e0] sm:$0xff]  ;;  %v244_v34 = vld [vmem:[#allocation5 + $0x450] sm:$0xff] }
  0x3f   :  { %747 = vmatpush.msrb.mxu2 %v208_v36  ;;  %766 = vmatpush.msrb.mxu3 %v225_v37  ;;  %v261_v35 = vld [vmem:[#allocation5 + $0x4d8] sm:$0xff]  ;;  %v276_v36 = vld [vmem:[#allocation5 + $0x550] sm:$0xff]  ;;  %v287_v61 = vld [vmem:[#allocation5 + $0x5a8] sm:$0xff] }
  0x40   :  { %708 = vmatpush.msrb.mxu0 %v175_v38  ;;  %727 = vmatpush.msrb.mxu1 %v192_v39  ;;  %v293_v37 = vld [vmem:[#allocation5 + $0x5d8] sm:$0xff]  ;;  %v243_v38 = vld [vmem:[#allocation5 + $0x448] sm:$0xff]  ;;  %v260_v39 = vld [vmem:[#allocation5 + $0x4d0] sm:$0xff] }
  0x41   :  { %748 = vmatpush.msrb.mxu2 %v207_v40  ;;  %767 = vmatpush.msrb.mxu3 %v224_v41  ;;  %v275_v40 = vld [vmem:[#allocation5 + $0x548] sm:$0xff]  ;;  %v292_v41 = vld [vmem:[#allocation5 + $0x5d0] sm:$0xff]  ;;  %v234_v12 = vld [vmem:[#allocation5 + $0x400] sm:$0xff] }
  0x42   :  { %709 = vmatpush.msrb.mxu0 %v174_v42  ;;  %728 = vmatpush.msrb.mxu1 %v191_v43  ;;  %v242_v42 = vld [vmem:[#allocation5 + $0x440] sm:$0xff]  ;;  %v259_v43 = vld [vmem:[#allocation5 + $0x4c8] sm:$0xff]  ;;  %v272_v52 = vld [vmem:[#allocation5 + $0x530] sm:$0xff] }
  0x43   :  { %749 = vmatpush.msrb.mxu2 %v206_v44  ;;  %768 = vmatpush.msrb.mxu3 %v223_v45  ;;  %v274_v44 = vld [vmem:[#allocation5 + $0x540] sm:$0xff]  ;;  %v291_v45 = vld [vmem:[#allocation5 + $0x5c8] sm:$0xff]  ;;  %v288_v57 = vld [vmem:[#allocation5 + $0x5b0] sm:$0xff] }
  0x44   :  { %710 = vmatpush.msrb.mxu0 %v173_v46  ;;  %729 = vmatpush.msrb.mxu1 %v190_v47  ;;  %v241_v46 = vld [vmem:[#allocation5 + $0x438] sm:$0xff]  ;;  %v258_v47 = vld [vmem:[#allocation5 + $0x4c0] sm:$0xff]  ;;  %v236_v2 = vld [vmem:[#allocation5 + $0x410] sm:$0xff] }
  0x45   :  { %750 = vmatpush.msrb.mxu2 %v205_v48  ;;  %769 = vmatpush.msrb.mxu3 %v222_v49  ;;  %v273_v48 = vld [vmem:[#allocation5 + $0x538] sm:$0xff]  ;;  %v290_v49 = vld [vmem:[#allocation5 + $0x5c0] sm:$0xff]  ;;  %v312_v26 = vld [vmem:[#allocation5 + $0x670] sm:$0xff] }
  0x46   :  { %711 = vmatpush.msrb.mxu0 %v172_v50  ;;  %730 = vmatpush.msrb.mxu1 %v189_v51  ;;  %v240_v50 = vld [vmem:[#allocation5 + $0x430] sm:$0xff]  ;;  %v257_v51 = vld [vmem:[#allocation5 + $0x4b8] sm:$0xff] }
  0x47   :  { %751 = vmatpush.msrb.mxu2 %v204_v53  ;;  %770 = vmatpush.msrb.mxu3 %v221_v54  ;;  %v289_v53 = vld [vmem:[#allocation5 + $0x5b8] sm:$0xff]  ;;  %v239_v54 = vld [vmem:[#allocation5 + $0x428] sm:$0xff] }
  0x48   :  { %712 = vmatpush.msrb.mxu0 %v171_v55  ;;  %731 = vmatpush.msrb.mxu1 %v188_v56  ;;  %v256_v55 = vld [vmem:[#allocation5 + $0x4b0] sm:$0xff]  ;;  %v271_v56 = vld [vmem:[#allocation5 + $0x528] sm:$0xff]  ;;  %v345_v21 = vld [vmem:[#allocation5 + $0x778] sm:$0xff] }
  0x49   :  { %752 = vmatpush.msrb.mxu2 %v203_v58  ;;  %771 = vmatpush.msrb.mxu3 %v220_v59  ;;  %v238_v58 = vld [vmem:[#allocation5 + $0x420] sm:$0xff]  ;;  %v255_v59 = vld [vmem:[#allocation5 + $0x4a8] sm:$0xff] }
  0x4a   :  { %674 = vmatmul.f32.vlgmr.msra.gmra.mxu2 %v76_v60  ;;  %713 = vmatpush.msrb.mxu0 %v170_v62  ;;  %v270_v60 = vld [vmem:[#allocation5 + $0x520] sm:$0xff]  ;;  %v237_v62 = vld [vmem:[#allocation5 + $0x418] sm:$0xff] }
  0x4b   :  { %732 = vmatpush.msrb.mxu1 %v187_v63  ;;  %753 = vmatpush.msrb.mxu2 %v202_v0  ;;  %v254_v63 = vld [vmem:[#allocation5 + $0x4a0] sm:$0xff]  ;;  %v269_v0 = vld [vmem:[#allocation5 + $0x518] sm:$0xff] }
  0x4c   :  { %772 = vmatpush.msrb.mxu3 %v219_v3  ;;  %634 = vmatmul.f32.vlgmr.msra.gmra.mxu0 %v74_v1  ;;  %v286_v1 = vld [vmem:[#allocation5 + $0x5a0] sm:$0xff]  ;;  %v253_v3 = vld [vmem:[#allocation5 + $0x498] sm:$0xff] }
  0x4d   :  { %694 = vmatmul.f32.vlgmr.msra.gmra.mxu3 %v77_v4  ;;  %778 = vmatpush.msra.mxu0 %v249_v5  ;;  %v268_v4 = vld [vmem:[#allocation5 + $0x510] sm:$0xff]  ;;  %v285_v5 = vld [vmem:[#allocation5 + $0x598] sm:$0xff] }
  0x4e   :  { %818 = vmatpush.msra.mxu2 %v281_v6  ;;  %733 = vmatpush.msrb.mxu1 %v186_v7  ;;  %v235_v6 = vld [vmem:[#allocation5 + $0x408] sm:$0xff]  ;;  %v252_v7 = vld [vmem:[#allocation5 + $0x490] sm:$0xff] }
  0x4f   :  { %773 = vmatpush.msrb.mxu3 %v218_v9  ;;  %654 = vmatmul.f32.vlgmr.msra.gmra.mxu1 %v75_v8  ;;  %v50_v8 = vld [vmem:[#allocation2 + $0x40] sm:$0xff]  ;;  %v52_v9 = vld [vmem:[#allocation2 + $0x50] sm:$0xff] }
  0x50   :  { %779 = vmatpush.msra.mxu0 %v248_v10  ;;  %798 = vmatpush.msra.mxu1 %v265_v11  ;;  %v267_v10 = vld [vmem:[#allocation5 + $0x508] sm:$0xff]  ;;  %v284_v11 = vld [vmem:[#allocation5 + $0x590] sm:$0xff]  ;;  %v84_v17 = vmul.f32 %v52_v9, %v52_v9  ;;  %v350_v9 = vld [vmem:[#allocation5 + $0x7a0] sm:$0xff] }
  0x51   :  { %819 = vmatpush.msra.mxu2 %v280_v13  ;;  %838 = vmatpush.msra.mxu3 %v297_v14  ;;  %v251_v13 = vld [vmem:[#allocation5 + $0x488] sm:$0xff]  ;;  %v266_v14 = vld [vmem:[#allocation5 + $0x500] sm:$0xff] }
  0x52   :  { %780 = vmatpush.msra.mxu0 %v247_v15  ;;  %799 = vmatpush.msra.mxu1 %v264_v16  ;;  %v283_v15 = vld [vmem:[#allocation5 + $0x588] sm:$0xff]  ;;  %v82_v16 = vmul.f32 %v50_v8, %v50_v8  ;;  %v333_v8 = vld [vmem:[#allocation5 + $0x718] sm:$0xff] }
  0x53   :  { %820 = vmatpush.msra.mxu2 %v279_v18  ;;  %839 = vmatpush.msra.mxu3 %v296_v19  ;;  %v51_v18 = vld [vmem:[#allocation2 + $0x48] sm:$0xff]  ;;  %v53_v19 = vld [vmem:[#allocation2 + $0x58] sm:$0xff] }
  0x54   :  { %754 = vmatmul.f32.vlgmr.msrb.gmra.mxu2 %v80_v20  ;;  %781 = vmatpush.msra.mxu0 %v246_v22  ;;  %v313_v20 = vld [vmem:[#allocation5 + $0x678] sm:$0xff]  ;;  %v250_v22 = vld [vmem:[#allocation5 + $0x480] sm:$0xff] }
  0x55   :  { %800 = vmatpush.msra.mxu1 %v263_v23  ;;  %821 = vmatpush.msra.mxu2 %v278_v24  ;;  %v282_v23 = vld [vmem:[#allocation5 + $0x580] sm:$0xff]  ;;  %v83_v24 = vmul.f32 %v51_v18, %v51_v18  ;;  %v331_v18 = vld [vmem:[#allocation5 + $0x708] sm:$0xff] }
  0x56   :  { %840 = vmatpush.msra.mxu3 %v295_v27  ;;  %714 = vmatmul.f32.vlgmr.msrb.gmra.mxu0 %v78_v25  ;;  %v85_v25 = vmul.f32 %v53_v19, %v53_v19  ;;  %v329_v27 = vld [vmem:[#allocation5 + $0x6f8] sm:$0xff]  ;;  %v348_v19 = vld [vmem:[#allocation5 + $0x790] sm:$0xff] }
  0x57   :  { %774 = vmatmul.f32.vlgmr.msrb.gmra.mxu3 %v81_v28  ;;  %782 = vmatpush.msra.mxu0 %v245_v29  ;;  %v344_v28 = vld [vmem:[#allocation5 + $0x770] sm:$0xff]  ;;  %v361_v29 = vld [vmem:[#allocation5 + $0x7f8] sm:$0xff] }
  0x58   :  { %801 = vmatpush.msra.mxu1 %v262_v30  ;;  %822 = vmatpush.msra.mxu2 %v277_v31  ;;  %v311_v30 = vld [vmem:[#allocation5 + $0x668] sm:$0xff]  ;;  %v328_v31 = vld [vmem:[#allocation5 + $0x6f0] sm:$0xff] }
  0x59   :  { %841 = vmatpush.msra.mxu3 %v294_v33  ;;  %734 = vmatmul.f32.vlgmr.msrb.gmra.mxu1 %v79_v32  ;;  %v343_v32 = vld [vmem:[#allocation5 + $0x768] sm:$0xff]  ;;  %v360_v33 = vld [vmem:[#allocation5 + $0x7f0] sm:$0xff] }
  0x5a   :  { %783 = vmatpush.msra.mxu0 %v244_v34  ;;  %802 = vmatpush.msra.mxu1 %v261_v35  ;;  %v310_v34 = vld [vmem:[#allocation5 + $0x660] sm:$0xff]  ;;  %v327_v35 = vld [vmem:[#allocation5 + $0x6e8] sm:$0xff] }
  0x5b   :  { %823 = vmatpush.msra.mxu2 %v276_v36  ;;  %842 = vmatpush.msra.mxu3 %v293_v37  ;;  %v342_v36 = vld [vmem:[#allocation5 + $0x760] sm:$0xff]  ;;  %v359_v37 = vld [vmem:[#allocation5 + $0x7e8] sm:$0xff] }
  0x5c   :  { %784 = vmatpush.msra.mxu0 %v243_v38  ;;  %803 = vmatpush.msra.mxu1 %v260_v39  ;;  %v309_v38 = vld [vmem:[#allocation5 + $0x658] sm:$0xff]  ;;  %v326_v39 = vld [vmem:[#allocation5 + $0x6e0] sm:$0xff] }
  0x5d   :  { %824 = vmatpush.msra.mxu2 %v275_v40  ;;  %843 = vmatpush.msra.mxu3 %v292_v41  ;;  %v341_v40 = vld [vmem:[#allocation5 + $0x758] sm:$0xff]  ;;  %v358_v41 = vld [vmem:[#allocation5 + $0x7e0] sm:$0xff] }
  0x5e   :  { %785 = vmatpush.msra.mxu0 %v242_v42  ;;  %804 = vmatpush.msra.mxu1 %v259_v43  ;;  %v308_v42 = vld [vmem:[#allocation5 + $0x650] sm:$0xff]  ;;  %v325_v43 = vld [vmem:[#allocation5 + $0x6d8] sm:$0xff] }
  0x5f   :  { %825 = vmatpush.msra.mxu2 %v274_v44  ;;  %844 = vmatpush.msra.mxu3 %v291_v45  ;;  %v340_v44 = vld [vmem:[#allocation5 + $0x750] sm:$0xff]  ;;  %v357_v45 = vld [vmem:[#allocation5 + $0x7d8] sm:$0xff] }
  0x60   :  { %786 = vmatpush.msra.mxu0 %v241_v46  ;;  %805 = vmatpush.msra.mxu1 %v258_v47  ;;  %v307_v46 = vld [vmem:[#allocation5 + $0x648] sm:$0xff]  ;;  %v324_v47 = vld [vmem:[#allocation5 + $0x6d0] sm:$0xff] }
  0x61   :  { %826 = vmatpush.msra.mxu2 %v273_v48  ;;  %845 = vmatpush.msra.mxu3 %v290_v49  ;;  %v339_v48 = vld [vmem:[#allocation5 + $0x748] sm:$0xff]  ;;  %v356_v49 = vld [vmem:[#allocation5 + $0x7d0] sm:$0xff] }
  0x62   :  { %787 = vmatpush.msra.mxu0 %v240_v50  ;;  %806 = vmatpush.msra.mxu1 %v257_v51  ;;  %v306_v50 = vld [vmem:[#allocation5 + $0x640] sm:$0xff]  ;;  %v323_v51 = vld [vmem:[#allocation5 + $0x6c8] sm:$0xff] }
  0x63   :  { %827 = vmatpush.msra.mxu2 %v272_v52  ;;  %846 = vmatpush.msra.mxu3 %v289_v53  ;;  %v338_v52 = vld [vmem:[#allocation5 + $0x740] sm:$0xff]  ;;  %v355_v53 = vld [vmem:[#allocation5 + $0x7c8] sm:$0xff] }
  0x64   :  { %788 = vmatpush.msra.mxu0 %v239_v54  ;;  %807 = vmatpush.msra.mxu1 %v256_v55  ;;  %v305_v54 = vld [vmem:[#allocation5 + $0x638] sm:$0xff]  ;;  %v322_v55 = vld [vmem:[#allocation5 + $0x6c0] sm:$0xff] }
  0x65   :  { %828 = vmatpush.msra.mxu2 %v271_v56  ;;  %847 = vmatpush.msra.mxu3 %v288_v57  ;;  %v337_v56 = vld [vmem:[#allocation5 + $0x738] sm:$0xff]  ;;  %v354_v57 = vld [vmem:[#allocation5 + $0x7c0] sm:$0xff] }
  0x66   :  { %789 = vmatpush.msra.mxu0 %v238_v58  ;;  %808 = vmatpush.msra.mxu1 %v255_v59  ;;  %v304_v58 = vld [vmem:[#allocation5 + $0x630] sm:$0xff]  ;;  %v321_v59 = vld [vmem:[#allocation5 + $0x6b8] sm:$0xff] }
  0x67   :  { %829 = vmatpush.msra.mxu2 %v270_v60  ;;  %848 = vmatpush.msra.mxu3 %v287_v61  ;;  %v336_v60 = vld [vmem:[#allocation5 + $0x730] sm:$0xff]  ;;  %v353_v61 = vld [vmem:[#allocation5 + $0x7b8] sm:$0xff] }
  0x68   :  { %790 = vmatpush.msra.mxu0 %v237_v62  ;;  %809 = vmatpush.msra.mxu1 %v254_v63  ;;  %v303_v62 = vld [vmem:[#allocation5 + $0x628] sm:$0xff]  ;;  %v320_v63 = vld [vmem:[#allocation5 + $0x6b0] sm:$0xff] }
  0x69   :  { %830 = vmatpush.msra.mxu2 %v269_v0  ;;  %849 = vmatpush.msra.mxu3 %v286_v1  ;;  %v335_v0 = vld [vmem:[#allocation5 + $0x728] sm:$0xff]  ;;  %v352_v1 = vld [vmem:[#allocation5 + $0x7b0] sm:$0xff] }
  0x6a   :  { %791 = vmatpush.msra.mxu0 %v236_v2  ;;  %810 = vmatpush.msra.mxu1 %v253_v3  ;;  %v302_v2 = vld [vmem:[#allocation5 + $0x620] sm:$0xff]  ;;  %v319_v3 = vld [vmem:[#allocation5 + $0x6a8] sm:$0xff] }
  0x6b   :  { %831 = vmatpush.msra.mxu2 %v268_v4  ;;  %850 = vmatpush.msra.mxu3 %v285_v5  ;;  %v334_v4 = vld [vmem:[#allocation5 + $0x720] sm:$0xff]  ;;  %v351_v5 = vld [vmem:[#allocation5 + $0x7a8] sm:$0xff] }
  0x6c   :  { %792 = vmatpush.msra.mxu0 %v235_v6  ;;  %811 = vmatpush.msra.mxu1 %v252_v7  ;;  %v301_v6 = vld [vmem:[#allocation5 + $0x618] sm:$0xff]  ;;  %v318_v7 = vld [vmem:[#allocation5 + $0x6a0] sm:$0xff] }
  0x6d   :  { %832 = vmatpush.msra.mxu2 %v267_v10  ;;  %851 = vmatpush.msra.mxu3 %v284_v11  ;;  %v300_v10 = vld [vmem:[#allocation5 + $0x610] sm:$0xff]  ;;  %v317_v11 = vld [vmem:[#allocation5 + $0x698] sm:$0xff] }
  0x6e   :  { %793 = vmatpush.msra.mxu0 %v234_v12  ;;  %812 = vmatpush.msra.mxu1 %v251_v13  ;;  %v332_v12 = vld [vmem:[#allocation5 + $0x710] sm:$0xff]  ;;  %v349_v13 = vld [vmem:[#allocation5 + $0x798] sm:$0xff] }
  0x6f   :  { %833 = vmatpush.msra.mxu2 %v266_v14  ;;  %852 = vmatpush.msra.mxu3 %v283_v15  ;;  %v299_v14 = vld [vmem:[#allocation5 + $0x608] sm:$0xff]  ;;  %v316_v15 = vld [vmem:[#allocation5 + $0x690] sm:$0xff] }
  0x70   :  { %794 = vmatmul.f32.vlgmr.msra.gmra.mxu0 %v82_v16  ;;  %834 = vmatmul.f32.vlgmr.msra.gmra.mxu2 %v84_v17  ;;  %v54_v16 = vld [vmem:[#allocation2 + $0x60] sm:$0xff]  ;;  %v56_v17 = vld [vmem:[#allocation2 + $0x70] sm:$0xff] }
  0x71   :  { %858 = vmatpush.msrb.mxu0 %v313_v20  ;;  %898 = vmatpush.msrb.mxu2 %v345_v21  ;;  %v298_v20 = vld [vmem:[#allocation5 + $0x600] sm:$0xff]  ;;  %v315_v21 = vld [vmem:[#allocation5 + $0x688] sm:$0xff] }
  0x72   :  { %813 = vmatpush.msra.mxu1 %v250_v22  ;;  %853 = vmatpush.msra.mxu3 %v282_v23  ;;  %v330_v22 = vld [vmem:[#allocation5 + $0x700] sm:$0xff]  ;;  %v347_v23 = vld [vmem:[#allocation5 + $0x788] sm:$0xff] }
  0x73   :  { %814 = vmatmul.f32.vlgmr.msra.gmra.mxu1 %v83_v24  ;;  %854 = vmatmul.f32.vlgmr.msra.gmra.mxu3 %v85_v25  ;;  %v86_v24 = vmul.f32 %v54_v16, %v54_v16  ;;  %v88_v25 = vmul.f32 %v56_v17, %v56_v17  ;;  %v397_v16 = vld [vmem:[#allocation5 + $0x918] sm:$0xff]  ;;  %v414_v17 = vld [vmem:[#allocation5 + $0x9a0] sm:$0xff] }
  0x74   :  { %859 = vmatpush.msrb.mxu0 %v312_v26  ;;  %878 = vmatpush.msrb.mxu1 %v329_v27  ;;  %v55_v26 = vld [vmem:[#allocation2 + $0x68] sm:$0xff]  ;;  %v57_v27 = vld [vmem:[#allocation2 + $0x78] sm:$0xff] }
  0x75   :  { %899 = vmatpush.msrb.mxu2 %v344_v28  ;;  %918 = vmatpush.msrb.mxu3 %v361_v29  ;;  %v377_v28 = vld [vmem:[#allocation5 + $0x878] sm:$0xff] }
  0x76   :  { %860 = vmatpush.msrb.mxu0 %v311_v30  ;;  %879 = vmatpush.msrb.mxu1 %v328_v31  ;;  %v409_v29 = vld [vmem:[#allocation5 + $0x978] sm:$0xff]  ;;  %v314_v30 = vld [vmem:[#allocation5 + $0x680] sm:$0xff] }
  0x77   :  { %900 = vmatpush.msrb.mxu2 %v343_v32  ;;  %919 = vmatpush.msrb.mxu3 %v360_v33  ;;  %v346_v31 = vld [vmem:[#allocation5 + $0x780] sm:$0xff]  ;;  %v87_v32 = vmul.f32 %v55_v26, %v55_v26  ;;  %v89_v33 = vmul.f32 %v57_v27, %v57_v27  ;;  %v395_v26 = vld [vmem:[#allocation5 + $0x908] sm:$0xff]  ;;  %v412_v27 = vld [vmem:[#allocation5 + $0x990] sm:$0xff] }
  0x78   :  { %861 = vmatpush.msrb.mxu0 %v310_v34  ;;  %880 = vmatpush.msrb.mxu1 %v327_v35  ;;  %v376_v34 = vld [vmem:[#allocation5 + $0x870] sm:$0xff]  ;;  %v393_v35 = vld [vmem:[#allocation5 + $0x8f8] sm:$0xff] }
  0x79   :  { %901 = vmatpush.msrb.mxu2 %v342_v36  ;;  %920 = vmatpush.msrb.mxu3 %v359_v37  ;;  %v408_v36 = vld [vmem:[#allocation5 + $0x970] sm:$0xff]  ;;  %v425_v37 = vld [vmem:[#allocation5 + $0x9f8] sm:$0xff] }
  0x7a   :  { %862 = vmatpush.msrb.mxu0 %v309_v38  ;;  %881 = vmatpush.msrb.mxu1 %v326_v39  ;;  %v375_v38 = vld [vmem:[#allocation5 + $0x868] sm:$0xff]  ;;  %v392_v39 = vld [vmem:[#allocation5 + $0x8f0] sm:$0xff] }
  0x7b   :  { %902 = vmatpush.msrb.mxu2 %v341_v40  ;;  %921 = vmatpush.msrb.mxu3 %v358_v41  ;;  %v407_v40 = vld [vmem:[#allocation5 + $0x968] sm:$0xff]  ;;  %v424_v41 = vld [vmem:[#allocation5 + $0x9f0] sm:$0xff] }
  0x7c   :  { %863 = vmatpush.msrb.mxu0 %v308_v42  ;;  %882 = vmatpush.msrb.mxu1 %v325_v43  ;;  %v374_v42 = vld [vmem:[#allocation5 + $0x860] sm:$0xff]  ;;  %v391_v43 = vld [vmem:[#allocation5 + $0x8e8] sm:$0xff] }
  0x7d   :  { %903 = vmatpush.msrb.mxu2 %v340_v44  ;;  %922 = vmatpush.msrb.mxu3 %v357_v45  ;;  %v406_v44 = vld [vmem:[#allocation5 + $0x960] sm:$0xff]  ;;  %v423_v45 = vld [vmem:[#allocation5 + $0x9e8] sm:$0xff] }
  0x7e   :  { %864 = vmatpush.msrb.mxu0 %v307_v46  ;;  %883 = vmatpush.msrb.mxu1 %v324_v47  ;;  %v373_v46 = vld [vmem:[#allocation5 + $0x858] sm:$0xff]  ;;  %v390_v47 = vld [vmem:[#allocation5 + $0x8e0] sm:$0xff] }
  0x7f   :  { %904 = vmatpush.msrb.mxu2 %v339_v48  ;;  %923 = vmatpush.msrb.mxu3 %v356_v49  ;;  %v405_v48 = vld [vmem:[#allocation5 + $0x958] sm:$0xff]  ;;  %v422_v49 = vld [vmem:[#allocation5 + $0x9e0] sm:$0xff] }
  0x80   :  { %865 = vmatpush.msrb.mxu0 %v306_v50  ;;  %884 = vmatpush.msrb.mxu1 %v323_v51  ;;  %v372_v50 = vld [vmem:[#allocation5 + $0x850] sm:$0xff]  ;;  %v389_v51 = vld [vmem:[#allocation5 + $0x8d8] sm:$0xff] }
  0x81   :  { %905 = vmatpush.msrb.mxu2 %v338_v52  ;;  %924 = vmatpush.msrb.mxu3 %v355_v53  ;;  %v404_v52 = vld [vmem:[#allocation5 + $0x950] sm:$0xff]  ;;  %v421_v53 = vld [vmem:[#allocation5 + $0x9d8] sm:$0xff] }
  0x82   :  { %866 = vmatpush.msrb.mxu0 %v305_v54  ;;  %885 = vmatpush.msrb.mxu1 %v322_v55  ;;  %v371_v54 = vld [vmem:[#allocation5 + $0x848] sm:$0xff]  ;;  %v388_v55 = vld [vmem:[#allocation5 + $0x8d0] sm:$0xff] }
  0x83   :  { %906 = vmatpush.msrb.mxu2 %v337_v56  ;;  %925 = vmatpush.msrb.mxu3 %v354_v57  ;;  %v403_v56 = vld [vmem:[#allocation5 + $0x948] sm:$0xff]  ;;  %v420_v57 = vld [vmem:[#allocation5 + $0x9d0] sm:$0xff] }
  0x84   :  { %867 = vmatpush.msrb.mxu0 %v304_v58  ;;  %886 = vmatpush.msrb.mxu1 %v321_v59  ;;  %v370_v58 = vld [vmem:[#allocation5 + $0x840] sm:$0xff]  ;;  %v387_v59 = vld [vmem:[#allocation5 + $0x8c8] sm:$0xff] }
  0x85   :  { %907 = vmatpush.msrb.mxu2 %v336_v60  ;;  %926 = vmatpush.msrb.mxu3 %v353_v61  ;;  %v402_v60 = vld [vmem:[#allocation5 + $0x940] sm:$0xff]  ;;  %v419_v61 = vld [vmem:[#allocation5 + $0x9c8] sm:$0xff] }
  0x86   :  { %868 = vmatpush.msrb.mxu0 %v303_v62  ;;  %887 = vmatpush.msrb.mxu1 %v320_v63  ;;  %v369_v62 = vld [vmem:[#allocation5 + $0x838] sm:$0xff]  ;;  %v386_v63 = vld [vmem:[#allocation5 + $0x8c0] sm:$0xff] }
  0x87   :  { %908 = vmatpush.msrb.mxu2 %v335_v0  ;;  %927 = vmatpush.msrb.mxu3 %v352_v1  ;;  %v401_v0 = vld [vmem:[#allocation5 + $0x938] sm:$0xff]  ;;  %v418_v1 = vld [vmem:[#allocation5 + $0x9c0] sm:$0xff] }
  0x88   :  { %869 = vmatpush.msrb.mxu0 %v302_v2  ;;  %888 = vmatpush.msrb.mxu1 %v319_v3  ;;  %v368_v2 = vld [vmem:[#allocation5 + $0x830] sm:$0xff]  ;;  %v385_v3 = vld [vmem:[#allocation5 + $0x8b8] sm:$0xff] }
  0x89   :  { %909 = vmatpush.msrb.mxu2 %v334_v4  ;;  %928 = vmatpush.msrb.mxu3 %v351_v5  ;;  %v400_v4 = vld [vmem:[#allocation5 + $0x930] sm:$0xff]  ;;  %v417_v5 = vld [vmem:[#allocation5 + $0x9b8] sm:$0xff] }
  0x8a   :  { %870 = vmatpush.msrb.mxu0 %v301_v6  ;;  %889 = vmatpush.msrb.mxu1 %v318_v7  ;;  %v367_v6 = vld [vmem:[#allocation5 + $0x828] sm:$0xff]  ;;  %v384_v7 = vld [vmem:[#allocation5 + $0x8b0] sm:$0xff] }
  0x8b   :  { %910 = vmatpush.msrb.mxu2 %v333_v8  ;;  %929 = vmatpush.msrb.mxu3 %v350_v9  ;;  %v399_v8 = vld [vmem:[#allocation5 + $0x928] sm:$0xff]  ;;  %v416_v9 = vld [vmem:[#allocation5 + $0x9b0] sm:$0xff] }
  0x8c   :  { %871 = vmatpush.msrb.mxu0 %v300_v10  ;;  %890 = vmatpush.msrb.mxu1 %v317_v11  ;;  %v366_v10 = vld [vmem:[#allocation5 + $0x820] sm:$0xff]  ;;  %v383_v11 = vld [vmem:[#allocation5 + $0x8a8] sm:$0xff] }
  0x8d   :  { %911 = vmatpush.msrb.mxu2 %v332_v12  ;;  %930 = vmatpush.msrb.mxu3 %v349_v13  ;;  %v398_v12 = vld [vmem:[#allocation5 + $0x920] sm:$0xff]  ;;  %v415_v13 = vld [vmem:[#allocation5 + $0x9a8] sm:$0xff] }
  0x8e   :  { %872 = vmatpush.msrb.mxu0 %v299_v14  ;;  %891 = vmatpush.msrb.mxu1 %v316_v15  ;;  %v365_v14 = vld [vmem:[#allocation5 + $0x818] sm:$0xff]  ;;  %v382_v15 = vld [vmem:[#allocation5 + $0x8a0] sm:$0xff] }
  0x8f   :  { %912 = vmatpush.msrb.mxu2 %v331_v18  ;;  %931 = vmatpush.msrb.mxu3 %v348_v19  ;;  %v364_v18 = vld [vmem:[#allocation5 + $0x810] sm:$0xff]  ;;  %v381_v19 = vld [vmem:[#allocation5 + $0x898] sm:$0xff] }
  0x90   :  { %873 = vmatpush.msrb.mxu0 %v298_v20  ;;  %892 = vmatpush.msrb.mxu1 %v315_v21  ;;  %v396_v20 = vld [vmem:[#allocation5 + $0x910] sm:$0xff]  ;;  %v413_v21 = vld [vmem:[#allocation5 + $0x998] sm:$0xff] }
  0x91   :  { %913 = vmatpush.msrb.mxu2 %v330_v22  ;;  %932 = vmatpush.msrb.mxu3 %v347_v23  ;;  %v363_v22 = vld [vmem:[#allocation5 + $0x808] sm:$0xff]  ;;  %v380_v23 = vld [vmem:[#allocation5 + $0x890] sm:$0xff] }
  0x92   :  { %874 = vmatmul.f32.vlgmr.msrb.gmra.mxu0 %v86_v24  ;;  %914 = vmatmul.f32.vlgmr.msrb.gmra.mxu2 %v88_v25  ;;  %v58_v24 = vld [vmem:[#allocation2 + $0x80] sm:$0xff]  ;;  %v60_v25 = vld [vmem:[#allocation2 + $0x90] sm:$0xff] }
  0x93   :  { %938 = vmatpush.msra.mxu0 %v377_v28  ;;  %978 = vmatpush.msra.mxu2 %v409_v29  ;;  %v362_v28 = vld [vmem:[#allocation5 + $0x800] sm:$0xff]  ;;  %v379_v29 = vld [vmem:[#allocation5 + $0x888] sm:$0xff] }
  0x94   :  { %893 = vmatpush.msrb.mxu1 %v314_v30  ;;  %933 = vmatpush.msrb.mxu3 %v346_v31  ;;  %v394_v30 = vld [vmem:[#allocation5 + $0x900] sm:$0xff]  ;;  %v411_v31 = vld [vmem:[#allocation5 + $0x988] sm:$0xff] }
  0x95   :  { %894 = vmatmul.f32.vlgmr.msrb.gmra.mxu1 %v87_v32  ;;  %934 = vmatmul.f32.vlgmr.msrb.gmra.mxu3 %v89_v33  ;;  %v90_v32 = vmul.f32 %v58_v24, %v58_v24  ;;  %v92_v33 = vmul.f32 %v60_v25, %v60_v25  ;;  %v461_v24 = vld [vmem:[#allocation5 + $0xb18] sm:$0xff]  ;;  %v478_v25 = vld [vmem:[#allocation5 + $0xba0] sm:$0xff] }
  0x96   :  { %939 = vmatpush.msra.mxu0 %v376_v34  ;;  %958 = vmatpush.msra.mxu1 %v393_v35  ;;  %v59_v34 = vld [vmem:[#allocation2 + $0x88] sm:$0xff]  ;;  %v61_v35 = vld [vmem:[#allocation2 + $0x98] sm:$0xff] }
  0x97   :  { %979 = vmatpush.msra.mxu2 %v408_v36  ;;  %998 = vmatpush.msra.mxu3 %v425_v37  ;;  %v441_v36 = vld [vmem:[#allocation5 + $0xa78] sm:$0xff] }
  0x98   :  { %940 = vmatpush.msra.mxu0 %v375_v38  ;;  %959 = vmatpush.msra.mxu1 %v392_v39  ;;  %v473_v37 = vld [vmem:[#allocation5 + $0xb78] sm:$0xff]  ;;  %v378_v38 = vld [vmem:[#allocation5 + $0x880] sm:$0xff] }
  0x99   :  { %980 = vmatpush.msra.mxu2 %v407_v40  ;;  %999 = vmatpush.msra.mxu3 %v424_v41  ;;  %v410_v39 = vld [vmem:[#allocation5 + $0x980] sm:$0xff]  ;;  %v91_v40 = vmul.f32 %v59_v34, %v59_v34  ;;  %v93_v41 = vmul.f32 %v61_v35, %v61_v35  ;;  %v459_v34 = vld [vmem:[#allocation5 + $0xb08] sm:$0xff]  ;;  %v476_v35 = vld [vmem:[#allocation5 + $0xb90] sm:$0xff] }
  0x9a   :  { %941 = vmatpush.msra.mxu0 %v374_v42  ;;  %960 = vmatpush.msra.mxu1 %v391_v43  ;;  %v440_v42 = vld [vmem:[#allocation5 + $0xa70] sm:$0xff]  ;;  %v457_v43 = vld [vmem:[#allocation5 + $0xaf8] sm:$0xff] }
  0x9b   :  { %981 = vmatpush.msra.mxu2 %v406_v44  ;;  %1000 = vmatpush.msra.mxu3 %v423_v45  ;;  %v472_v44 = vld [vmem:[#allocation5 + $0xb70] sm:$0xff]  ;;  %v489_v45 = vld [vmem:[#allocation5 + $0xbf8] sm:$0xff] }
  0x9c   :  { %942 = vmatpush.msra.mxu0 %v373_v46  ;;  %961 = vmatpush.msra.mxu1 %v390_v47  ;;  %v439_v46 = vld [vmem:[#allocation5 + $0xa68] sm:$0xff]  ;;  %v456_v47 = vld [vmem:[#allocation5 + $0xaf0] sm:$0xff] }
  0x9d   :  { %982 = vmatpush.msra.mxu2 %v405_v48  ;;  %1001 = vmatpush.msra.mxu3 %v422_v49  ;;  %v471_v48 = vld [vmem:[#allocation5 + $0xb68] sm:$0xff]  ;;  %v488_v49 = vld [vmem:[#allocation5 + $0xbf0] sm:$0xff] }
  0x9e   :  { %943 = vmatpush.msra.mxu0 %v372_v50  ;;  %962 = vmatpush.msra.mxu1 %v389_v51  ;;  %v438_v50 = vld [vmem:[#allocation5 + $0xa60] sm:$0xff]  ;;  %v455_v51 = vld [vmem:[#allocation5 + $0xae8] sm:$0xff] }
  0x9f   :  { %983 = vmatpush.msra.mxu2 %v404_v52  ;;  %1002 = vmatpush.msra.mxu3 %v421_v53  ;;  %v470_v52 = vld [vmem:[#allocation5 + $0xb60] sm:$0xff]  ;;  %v487_v53 = vld [vmem:[#allocation5 + $0xbe8] sm:$0xff] }
  0xa0   :  { %944 = vmatpush.msra.mxu0 %v371_v54  ;;  %963 = vmatpush.msra.mxu1 %v388_v55  ;;  %v437_v54 = vld [vmem:[#allocation5 + $0xa58] sm:$0xff]  ;;  %v454_v55 = vld [vmem:[#allocation5 + $0xae0] sm:$0xff] }
  0xa1   :  { %984 = vmatpush.msra.mxu2 %v403_v56  ;;  %1003 = vmatpush.msra.mxu3 %v420_v57  ;;  %v469_v56 = vld [vmem:[#allocation5 + $0xb58] sm:$0xff]  ;;  %v486_v57 = vld [vmem:[#allocation5 + $0xbe0] sm:$0xff] }
  0xa2   :  { %945 = vmatpush.msra.mxu0 %v370_v58  ;;  %964 = vmatpush.msra.mxu1 %v387_v59  ;;  %v436_v58 = vld [vmem:[#allocation5 + $0xa50] sm:$0xff]  ;;  %v453_v59 = vld [vmem:[#allocation5 + $0xad8] sm:$0xff] }
  0xa3   :  { %985 = vmatpush.msra.mxu2 %v402_v60  ;;  %1004 = vmatpush.msra.mxu3 %v419_v61  ;;  %v468_v60 = vld [vmem:[#allocation5 + $0xb50] sm:$0xff]  ;;  %v485_v61 = vld [vmem:[#allocation5 + $0xbd8] sm:$0xff] }
  0xa4   :  { %946 = vmatpush.msra.mxu0 %v369_v62  ;;  %965 = vmatpush.msra.mxu1 %v386_v63  ;;  %v435_v62 = vld [vmem:[#allocation5 + $0xa48] sm:$0xff]  ;;  %v452_v63 = vld [vmem:[#allocation5 + $0xad0] sm:$0xff] }
  0xa5   :  { %986 = vmatpush.msra.mxu2 %v401_v0  ;;  %1005 = vmatpush.msra.mxu3 %v418_v1  ;;  %v467_v0 = vld [vmem:[#allocation5 + $0xb48] sm:$0xff]  ;;  %v484_v1 = vld [vmem:[#allocation5 + $0xbd0] sm:$0xff] }
  0xa6   :  { %947 = vmatpush.msra.mxu0 %v368_v2  ;;  %966 = vmatpush.msra.mxu1 %v385_v3  ;;  %v434_v2 = vld [vmem:[#allocation5 + $0xa40] sm:$0xff]  ;;  %v451_v3 = vld [vmem:[#allocation5 + $0xac8] sm:$0xff] }
  0xa7   :  { %987 = vmatpush.msra.mxu2 %v400_v4  ;;  %1006 = vmatpush.msra.mxu3 %v417_v5  ;;  %v466_v4 = vld [vmem:[#allocation5 + $0xb40] sm:$0xff]  ;;  %v483_v5 = vld [vmem:[#allocation5 + $0xbc8] sm:$0xff] }
  0xa8   :  { %948 = vmatpush.msra.mxu0 %v367_v6  ;;  %967 = vmatpush.msra.mxu1 %v384_v7  ;;  %v433_v6 = vld [vmem:[#allocation5 + $0xa38] sm:$0xff]  ;;  %v450_v7 = vld [vmem:[#allocation5 + $0xac0] sm:$0xff] }
  0xa9   :  { %988 = vmatpush.msra.mxu2 %v399_v8  ;;  %1007 = vmatpush.msra.mxu3 %v416_v9  ;;  %v465_v8 = vld [vmem:[#allocation5 + $0xb38] sm:$0xff]  ;;  %v482_v9 = vld [vmem:[#allocation5 + $0xbc0] sm:$0xff] }
  0xaa   :  { %949 = vmatpush.msra.mxu0 %v366_v10  ;;  %968 = vmatpush.msra.mxu1 %v383_v11  ;;  %v432_v10 = vld [vmem:[#allocation5 + $0xa30] sm:$0xff]  ;;  %v449_v11 = vld [vmem:[#allocation5 + $0xab8] sm:$0xff] }
  0xab   :  { %989 = vmatpush.msra.mxu2 %v398_v12  ;;  %1008 = vmatpush.msra.mxu3 %v415_v13  ;;  %v464_v12 = vld [vmem:[#allocation5 + $0xb30] sm:$0xff]  ;;  %v481_v13 = vld [vmem:[#allocation5 + $0xbb8] sm:$0xff] }
  0xac   :  { %950 = vmatpush.msra.mxu0 %v365_v14  ;;  %969 = vmatpush.msra.mxu1 %v382_v15  ;;  %v431_v14 = vld [vmem:[#allocation5 + $0xa28] sm:$0xff]  ;;  %v448_v15 = vld [vmem:[#allocation5 + $0xab0] sm:$0xff] }
  0xad   :  { %990 = vmatpush.msra.mxu2 %v397_v16  ;;  %1009 = vmatpush.msra.mxu3 %v414_v17  ;;  %v463_v16 = vld [vmem:[#allocation5 + $0xb28] sm:$0xff]  ;;  %v480_v17 = vld [vmem:[#allocation5 + $0xbb0] sm:$0xff] }
  0xae   :  { %951 = vmatpush.msra.mxu0 %v364_v18  ;;  %970 = vmatpush.msra.mxu1 %v381_v19  ;;  %v430_v18 = vld [vmem:[#allocation5 + $0xa20] sm:$0xff]  ;;  %v447_v19 = vld [vmem:[#allocation5 + $0xaa8] sm:$0xff] }
  0xaf   :  { %991 = vmatpush.msra.mxu2 %v396_v20  ;;  %1010 = vmatpush.msra.mxu3 %v413_v21  ;;  %v462_v20 = vld [vmem:[#allocation5 + $0xb20] sm:$0xff]  ;;  %v479_v21 = vld [vmem:[#allocation5 + $0xba8] sm:$0xff] }
  0xb0   :  { %952 = vmatpush.msra.mxu0 %v363_v22  ;;  %971 = vmatpush.msra.mxu1 %v380_v23  ;;  %v429_v22 = vld [vmem:[#allocation5 + $0xa18] sm:$0xff]  ;;  %v446_v23 = vld [vmem:[#allocation5 + $0xaa0] sm:$0xff] }
  0xb1   :  { %992 = vmatpush.msra.mxu2 %v395_v26  ;;  %1011 = vmatpush.msra.mxu3 %v412_v27  ;;  %v428_v26 = vld [vmem:[#allocation5 + $0xa10] sm:$0xff]  ;;  %v445_v27 = vld [vmem:[#allocation5 + $0xa98] sm:$0xff] }
  0xb2   :  { %953 = vmatpush.msra.mxu0 %v362_v28  ;;  %972 = vmatpush.msra.mxu1 %v379_v29  ;;  %v460_v28 = vld [vmem:[#allocation5 + $0xb10] sm:$0xff]  ;;  %v477_v29 = vld [vmem:[#allocation5 + $0xb98] sm:$0xff] }
  0xb3   :  { %993 = vmatpush.msra.mxu2 %v394_v30  ;;  %1012 = vmatpush.msra.mxu3 %v411_v31  ;;  %v427_v30 = vld [vmem:[#allocation5 + $0xa08] sm:$0xff]  ;;  %v444_v31 = vld [vmem:[#allocation5 + $0xa90] sm:$0xff] }
  0xb4   :  { %954 = vmatmul.f32.vlgmr.msra.gmra.mxu0 %v90_v32  ;;  %994 = vmatmul.f32.vlgmr.msra.gmra.mxu2 %v92_v33  ;;  %v62_v32 = vld [vmem:[#allocation2 + $0xa0] sm:$0xff]  ;;  %v64_v33 = vld [vmem:[#allocation2 + $0xb0] sm:$0xff] }
  0xb5   :  { %1018 = vmatpush.msrb.mxu0 %v441_v36  ;;  %1058 = vmatpush.msrb.mxu2 %v473_v37  ;;  %v426_v36 = vld [vmem:[#allocation5 + $0xa00] sm:$0xff]  ;;  %v443_v37 = vld [vmem:[#allocation5 + $0xa88] sm:$0xff] }
  0xb6   :  { %973 = vmatpush.msra.mxu1 %v378_v38  ;;  %1013 = vmatpush.msra.mxu3 %v410_v39  ;;  %v458_v38 = vld [vmem:[#allocation5 + $0xb00] sm:$0xff]  ;;  %v475_v39 = vld [vmem:[#allocation5 + $0xb88] sm:$0xff] }
  0xb7   :  { %974 = vmatmul.f32.vlgmr.msra.gmra.mxu1 %v91_v40  ;;  %1014 = vmatmul.f32.vlgmr.msra.gmra.mxu3 %v93_v41  ;;  %v94_v40 = vmul.f32 %v62_v32, %v62_v32  ;;  %v96_v41 = vmul.f32 %v64_v33, %v64_v33  ;;  %v525_v32 = vld [vmem:[#allocation5 + $0xd18] sm:$0xff]  ;;  %v542_v33 = vld [vmem:[#allocation5 + $0xda0] sm:$0xff] }
  0xb8   :  { %1019 = vmatpush.msrb.mxu0 %v440_v42  ;;  %1038 = vmatpush.msrb.mxu1 %v457_v43  ;;  %v63_v42 = vld [vmem:[#allocation2 + $0xa8] sm:$0xff]  ;;  %v65_v43 = vld [vmem:[#allocation2 + $0xb8] sm:$0xff] }
  0xb9   :  { %1059 = vmatpush.msrb.mxu2 %v472_v44  ;;  %1078 = vmatpush.msrb.mxu3 %v489_v45  ;;  %v505_v44 = vld [vmem:[#allocation5 + $0xc78] sm:$0xff] }
  0xba   :  { %1020 = vmatpush.msrb.mxu0 %v439_v46  ;;  %1039 = vmatpush.msrb.mxu1 %v456_v47  ;;  %v537_v45 = vld [vmem:[#allocation5 + $0xd78] sm:$0xff]  ;;  %v442_v46 = vld [vmem:[#allocation5 + $0xa80] sm:$0xff] }
  0xbb   :  { %1060 = vmatpush.msrb.mxu2 %v471_v48  ;;  %1079 = vmatpush.msrb.mxu3 %v488_v49  ;;  %v474_v47 = vld [vmem:[#allocation5 + $0xb80] sm:$0xff]  ;;  %v95_v48 = vmul.f32 %v63_v42, %v63_v42  ;;  %v97_v49 = vmul.f32 %v65_v43, %v65_v43  ;;  %v523_v42 = vld [vmem:[#allocation5 + $0xd08] sm:$0xff]  ;;  %v540_v43 = vld [vmem:[#allocation5 + $0xd90] sm:$0xff] }
  0xbc   :  { %1021 = vmatpush.msrb.mxu0 %v438_v50  ;;  %1040 = vmatpush.msrb.mxu1 %v455_v51  ;;  %v504_v50 = vld [vmem:[#allocation5 + $0xc70] sm:$0xff]  ;;  %v521_v51 = vld [vmem:[#allocation5 + $0xcf8] sm:$0xff] }
  0xbd   :  { %1061 = vmatpush.msrb.mxu2 %v470_v52  ;;  %1080 = vmatpush.msrb.mxu3 %v487_v53  ;;  %v536_v52 = vld [vmem:[#allocation5 + $0xd70] sm:$0xff]  ;;  %v553_v53 = vld [vmem:[#allocation5 + $0xdf8] sm:$0xff] }
  0xbe   :  { %1022 = vmatpush.msrb.mxu0 %v437_v54  ;;  %1041 = vmatpush.msrb.mxu1 %v454_v55  ;;  %v503_v54 = vld [vmem:[#allocation5 + $0xc68] sm:$0xff]  ;;  %v520_v55 = vld [vmem:[#allocation5 + $0xcf0] sm:$0xff] }
  0xbf   :  { %1062 = vmatpush.msrb.mxu2 %v469_v56  ;;  %1081 = vmatpush.msrb.mxu3 %v486_v57  ;;  %v535_v56 = vld [vmem:[#allocation5 + $0xd68] sm:$0xff]  ;;  %v552_v57 = vld [vmem:[#allocation5 + $0xdf0] sm:$0xff] }
  0xc0   :  { %1023 = vmatpush.msrb.mxu0 %v436_v58  ;;  %1042 = vmatpush.msrb.mxu1 %v453_v59  ;;  %v502_v58 = vld [vmem:[#allocation5 + $0xc60] sm:$0xff]  ;;  %v519_v59 = vld [vmem:[#allocation5 + $0xce8] sm:$0xff] }
  0xc1   :  { %1063 = vmatpush.msrb.mxu2 %v468_v60  ;;  %1082 = vmatpush.msrb.mxu3 %v485_v61  ;;  %v534_v60 = vld [vmem:[#allocation5 + $0xd60] sm:$0xff]  ;;  %v551_v61 = vld [vmem:[#allocation5 + $0xde8] sm:$0xff] }
  0xc2   :  { %1024 = vmatpush.msrb.mxu0 %v435_v62  ;;  %1043 = vmatpush.msrb.mxu1 %v452_v63  ;;  %v501_v62 = vld [vmem:[#allocation5 + $0xc58] sm:$0xff]  ;;  %v518_v63 = vld [vmem:[#allocation5 + $0xce0] sm:$0xff] }
  0xc3   :  { %1064 = vmatpush.msrb.mxu2 %v467_v0  ;;  %1083 = vmatpush.msrb.mxu3 %v484_v1  ;;  %v533_v0 = vld [vmem:[#allocation5 + $0xd58] sm:$0xff]  ;;  %v550_v1 = vld [vmem:[#allocation5 + $0xde0] sm:$0xff] }
  0xc4   :  { %1025 = vmatpush.msrb.mxu0 %v434_v2  ;;  %1044 = vmatpush.msrb.mxu1 %v451_v3  ;;  %v500_v2 = vld [vmem:[#allocation5 + $0xc50] sm:$0xff]  ;;  %v517_v3 = vld [vmem:[#allocation5 + $0xcd8] sm:$0xff] }
  0xc5   :  { %1065 = vmatpush.msrb.mxu2 %v466_v4  ;;  %1084 = vmatpush.msrb.mxu3 %v483_v5  ;;  %v532_v4 = vld [vmem:[#allocation5 + $0xd50] sm:$0xff]  ;;  %v549_v5 = vld [vmem:[#allocation5 + $0xdd8] sm:$0xff] }
  0xc6   :  { %1026 = vmatpush.msrb.mxu0 %v433_v6  ;;  %1045 = vmatpush.msrb.mxu1 %v450_v7  ;;  %v499_v6 = vld [vmem:[#allocation5 + $0xc48] sm:$0xff]  ;;  %v516_v7 = vld [vmem:[#allocation5 + $0xcd0] sm:$0xff] }
  0xc7   :  { %1066 = vmatpush.msrb.mxu2 %v465_v8  ;;  %1085 = vmatpush.msrb.mxu3 %v482_v9  ;;  %v531_v8 = vld [vmem:[#allocation5 + $0xd48] sm:$0xff]  ;;  %v548_v9 = vld [vmem:[#allocation5 + $0xdd0] sm:$0xff] }
  0xc8   :  { %1027 = vmatpush.msrb.mxu0 %v432_v10  ;;  %1046 = vmatpush.msrb.mxu1 %v449_v11  ;;  %v498_v10 = vld [vmem:[#allocation5 + $0xc40] sm:$0xff]  ;;  %v515_v11 = vld [vmem:[#allocation5 + $0xcc8] sm:$0xff] }
  0xc9   :  { %1067 = vmatpush.msrb.mxu2 %v464_v12  ;;  %1086 = vmatpush.msrb.mxu3 %v481_v13  ;;  %v530_v12 = vld [vmem:[#allocation5 + $0xd40] sm:$0xff]  ;;  %v547_v13 = vld [vmem:[#allocation5 + $0xdc8] sm:$0xff] }
  0xca   :  { %1028 = vmatpush.msrb.mxu0 %v431_v14  ;;  %1047 = vmatpush.msrb.mxu1 %v448_v15  ;;  %v497_v14 = vld [vmem:[#allocation5 + $0xc38] sm:$0xff]  ;;  %v514_v15 = vld [vmem:[#allocation5 + $0xcc0] sm:$0xff] }
  0xcb   :  { %1068 = vmatpush.msrb.mxu2 %v463_v16  ;;  %1087 = vmatpush.msrb.mxu3 %v480_v17  ;;  %v529_v16 = vld [vmem:[#allocation5 + $0xd38] sm:$0xff]  ;;  %v546_v17 = vld [vmem:[#allocation5 + $0xdc0] sm:$0xff] }
  0xcc   :  { %1029 = vmatpush.msrb.mxu0 %v430_v18  ;;  %1048 = vmatpush.msrb.mxu1 %v447_v19  ;;  %v496_v18 = vld [vmem:[#allocation5 + $0xc30] sm:$0xff]  ;;  %v513_v19 = vld [vmem:[#allocation5 + $0xcb8] sm:$0xff] }
  0xcd   :  { %1069 = vmatpush.msrb.mxu2 %v462_v20  ;;  %1088 = vmatpush.msrb.mxu3 %v479_v21  ;;  %v528_v20 = vld [vmem:[#allocation5 + $0xd30] sm:$0xff]  ;;  %v545_v21 = vld [vmem:[#allocation5 + $0xdb8] sm:$0xff] }
  0xce   :  { %1030 = vmatpush.msrb.mxu0 %v429_v22  ;;  %1049 = vmatpush.msrb.mxu1 %v446_v23  ;;  %v495_v22 = vld [vmem:[#allocation5 + $0xc28] sm:$0xff]  ;;  %v512_v23 = vld [vmem:[#allocation5 + $0xcb0] sm:$0xff] }
  0xcf   :  { %1070 = vmatpush.msrb.mxu2 %v461_v24  ;;  %1089 = vmatpush.msrb.mxu3 %v478_v25  ;;  %v527_v24 = vld [vmem:[#allocation5 + $0xd28] sm:$0xff]  ;;  %v544_v25 = vld [vmem:[#allocation5 + $0xdb0] sm:$0xff] }
  0xd0   :  { %1031 = vmatpush.msrb.mxu0 %v428_v26  ;;  %1050 = vmatpush.msrb.mxu1 %v445_v27  ;;  %v494_v26 = vld [vmem:[#allocation5 + $0xc20] sm:$0xff]  ;;  %v511_v27 = vld [vmem:[#allocation5 + $0xca8] sm:$0xff] }
  0xd1   :  { %1071 = vmatpush.msrb.mxu2 %v460_v28  ;;  %1090 = vmatpush.msrb.mxu3 %v477_v29  ;;  %v526_v28 = vld [vmem:[#allocation5 + $0xd20] sm:$0xff]  ;;  %v543_v29 = vld [vmem:[#allocation5 + $0xda8] sm:$0xff] }
  0xd2   :  { %1032 = vmatpush.msrb.mxu0 %v427_v30  ;;  %1051 = vmatpush.msrb.mxu1 %v444_v31  ;;  %v493_v30 = vld [vmem:[#allocation5 + $0xc18] sm:$0xff]  ;;  %v510_v31 = vld [vmem:[#allocation5 + $0xca0] sm:$0xff] }
  0xd3   :  { %1072 = vmatpush.msrb.mxu2 %v459_v34  ;;  %1091 = vmatpush.msrb.mxu3 %v476_v35  ;;  %v492_v34 = vld [vmem:[#allocation5 + $0xc10] sm:$0xff]  ;;  %v509_v35 = vld [vmem:[#allocation5 + $0xc98] sm:$0xff] }
  0xd4   :  { %1033 = vmatpush.msrb.mxu0 %v426_v36  ;;  %1052 = vmatpush.msrb.mxu1 %v443_v37  ;;  %v524_v36 = vld [vmem:[#allocation5 + $0xd10] sm:$0xff]  ;;  %v541_v37 = vld [vmem:[#allocation5 + $0xd98] sm:$0xff] }
  0xd5   :  { %1073 = vmatpush.msrb.mxu2 %v458_v38  ;;  %1092 = vmatpush.msrb.mxu3 %v475_v39  ;;  %v491_v38 = vld [vmem:[#allocation5 + $0xc08] sm:$0xff]  ;;  %v508_v39 = vld [vmem:[#allocation5 + $0xc90] sm:$0xff] }
  0xd6   :  { %1034 = vmatmul.f32.vlgmr.msrb.gmra.mxu0 %v94_v40  ;;  %1074 = vmatmul.f32.vlgmr.msrb.gmra.mxu2 %v96_v41  ;;  %v66_v40 = vld [vmem:[#allocation2 + $0xc0] sm:$0xff]  ;;  %v68_v41 = vld [vmem:[#allocation2 + $0xd0] sm:$0xff] }
  0xd7   :  { %1098 = vmatpush.msra.mxu0 %v505_v44  ;;  %1138 = vmatpush.msra.mxu2 %v537_v45  ;;  %v490_v44 = vld [vmem:[#allocation5 + $0xc00] sm:$0xff]  ;;  %v507_v45 = vld [vmem:[#allocation5 + $0xc88] sm:$0xff] }
  0xd8   :  { %1053 = vmatpush.msrb.mxu1 %v442_v46  ;;  %1093 = vmatpush.msrb.mxu3 %v474_v47  ;;  %v522_v46 = vld [vmem:[#allocation5 + $0xd00] sm:$0xff]  ;;  %v539_v47 = vld [vmem:[#allocation5 + $0xd88] sm:$0xff] }
  0xd9   :  { %1054 = vmatmul.f32.vlgmr.msrb.gmra.mxu1 %v95_v48  ;;  %1094 = vmatmul.f32.vlgmr.msrb.gmra.mxu3 %v97_v49  ;;  %v98_v48 = vmul.f32 %v66_v40, %v66_v40  ;;  %v100_v49 = vmul.f32 %v68_v41, %v68_v41  ;;  %v589_v40 = vld [vmem:[#allocation5 + $0xf18] sm:$0xff]  ;;  %v606_v41 = vld [vmem:[#allocation5 + $0xfa0] sm:$0xff] }
  0xda   :  { %1099 = vmatpush.msra.mxu0 %v504_v50  ;;  %1118 = vmatpush.msra.mxu1 %v521_v51  ;;  %v67_v50 = vld [vmem:[#allocation2 + $0xc8] sm:$0xff]  ;;  %v69_v51 = vld [vmem:[#allocation2 + $0xd8] sm:$0xff] }
  0xdb   :  { %1139 = vmatpush.msra.mxu2 %v536_v52  ;;  %1158 = vmatpush.msra.mxu3 %v553_v53  ;;  %v569_v52 = vld [vmem:[#allocation5 + $0xe78] sm:$0xff] }
  0xdc   :  { %1100 = vmatpush.msra.mxu0 %v503_v54  ;;  %1119 = vmatpush.msra.mxu1 %v520_v55  ;;  %v601_v53 = vld [vmem:[#allocation5 + $0xf78] sm:$0xff]  ;;  %v506_v54 = vld [vmem:[#allocation5 + $0xc80] sm:$0xff] }
  0xdd   :  { %1140 = vmatpush.msra.mxu2 %v535_v56  ;;  %1159 = vmatpush.msra.mxu3 %v552_v57  ;;  %v538_v55 = vld [vmem:[#allocation5 + $0xd80] sm:$0xff]  ;;  %v99_v56 = vmul.f32 %v67_v50, %v67_v50  ;;  %v101_v57 = vmul.f32 %v69_v51, %v69_v51  ;;  %v587_v50 = vld [vmem:[#allocation5 + $0xf08] sm:$0xff]  ;;  %v604_v51 = vld [vmem:[#allocation5 + $0xf90] sm:$0xff] }
  0xde   :  { %1101 = vmatpush.msra.mxu0 %v502_v58  ;;  %1120 = vmatpush.msra.mxu1 %v519_v59  ;;  %v568_v58 = vld [vmem:[#allocation5 + $0xe70] sm:$0xff]  ;;  %v585_v59 = vld [vmem:[#allocation5 + $0xef8] sm:$0xff] }
  0xdf   :  { %1141 = vmatpush.msra.mxu2 %v534_v60  ;;  %1160 = vmatpush.msra.mxu3 %v551_v61  ;;  %v600_v60 = vld [vmem:[#allocation5 + $0xf70] sm:$0xff]  ;;  %v617_v61 = vld [vmem:[#allocation5 + $0xff8] sm:$0xff] }
  0xe0   :  { %1102 = vmatpush.msra.mxu0 %v501_v62  ;;  %1121 = vmatpush.msra.mxu1 %v518_v63  ;;  %v567_v62 = vld [vmem:[#allocation5 + $0xe68] sm:$0xff]  ;;  %v584_v63 = vld [vmem:[#allocation5 + $0xef0] sm:$0xff] }
  0xe1   :  { %1142 = vmatpush.msra.mxu2 %v533_v0  ;;  %1161 = vmatpush.msra.mxu3 %v550_v1  ;;  %v599_v0 = vld [vmem:[#allocation5 + $0xf68] sm:$0xff]  ;;  %v616_v1 = vld [vmem:[#allocation5 + $0xff0] sm:$0xff] }
  0xe2   :  { %1103 = vmatpush.msra.mxu0 %v500_v2  ;;  %1122 = vmatpush.msra.mxu1 %v517_v3  ;;  %v566_v2 = vld [vmem:[#allocation5 + $0xe60] sm:$0xff]  ;;  %v583_v3 = vld [vmem:[#allocation5 + $0xee8] sm:$0xff] }
  0xe3   :  { %1143 = vmatpush.msra.mxu2 %v532_v4  ;;  %1162 = vmatpush.msra.mxu3 %v549_v5  ;;  %v598_v4 = vld [vmem:[#allocation5 + $0xf60] sm:$0xff]  ;;  %v615_v5 = vld [vmem:[#allocation5 + $0xfe8] sm:$0xff] }
  0xe4   :  { %1104 = vmatpush.msra.mxu0 %v499_v6  ;;  %1123 = vmatpush.msra.mxu1 %v516_v7  ;;  %v565_v6 = vld [vmem:[#allocation5 + $0xe58] sm:$0xff]  ;;  %v582_v7 = vld [vmem:[#allocation5 + $0xee0] sm:$0xff] }
  0xe5   :  { %1144 = vmatpush.msra.mxu2 %v531_v8  ;;  %1163 = vmatpush.msra.mxu3 %v548_v9  ;;  %v597_v8 = vld [vmem:[#allocation5 + $0xf58] sm:$0xff]  ;;  %v614_v9 = vld [vmem:[#allocation5 + $0xfe0] sm:$0xff] }
  0xe6   :  { %1105 = vmatpush.msra.mxu0 %v498_v10  ;;  %1124 = vmatpush.msra.mxu1 %v515_v11  ;;  %v564_v10 = vld [vmem:[#allocation5 + $0xe50] sm:$0xff]  ;;  %v581_v11 = vld [vmem:[#allocation5 + $0xed8] sm:$0xff] }
  0xe7   :  { %1145 = vmatpush.msra.mxu2 %v530_v12  ;;  %1164 = vmatpush.msra.mxu3 %v547_v13  ;;  %v596_v12 = vld [vmem:[#allocation5 + $0xf50] sm:$0xff]  ;;  %v613_v13 = vld [vmem:[#allocation5 + $0xfd8] sm:$0xff] }
  0xe8   :  { %1106 = vmatpush.msra.mxu0 %v497_v14  ;;  %1125 = vmatpush.msra.mxu1 %v514_v15  ;;  %v563_v14 = vld [vmem:[#allocation5 + $0xe48] sm:$0xff]  ;;  %v580_v15 = vld [vmem:[#allocation5 + $0xed0] sm:$0xff] }
  0xe9   :  { %1146 = vmatpush.msra.mxu2 %v529_v16  ;;  %1165 = vmatpush.msra.mxu3 %v546_v17  ;;  %v595_v16 = vld [vmem:[#allocation5 + $0xf48] sm:$0xff]  ;;  %v612_v17 = vld [vmem:[#allocation5 + $0xfd0] sm:$0xff] }
  0xea   :  { %1107 = vmatpush.msra.mxu0 %v496_v18  ;;  %1126 = vmatpush.msra.mxu1 %v513_v19  ;;  %v562_v18 = vld [vmem:[#allocation5 + $0xe40] sm:$0xff]  ;;  %v579_v19 = vld [vmem:[#allocation5 + $0xec8] sm:$0xff] }
  0xeb   :  { %1147 = vmatpush.msra.mxu2 %v528_v20  ;;  %1166 = vmatpush.msra.mxu3 %v545_v21  ;;  %v594_v20 = vld [vmem:[#allocation5 + $0xf40] sm:$0xff]  ;;  %v611_v21 = vld [vmem:[#allocation5 + $0xfc8] sm:$0xff] }
  0xec   :  { %1108 = vmatpush.msra.mxu0 %v495_v22  ;;  %1127 = vmatpush.msra.mxu1 %v512_v23  ;;  %v561_v22 = vld [vmem:[#allocation5 + $0xe38] sm:$0xff]  ;;  %v578_v23 = vld [vmem:[#allocation5 + $0xec0] sm:$0xff] }
  0xed   :  { %1148 = vmatpush.msra.mxu2 %v527_v24  ;;  %1167 = vmatpush.msra.mxu3 %v544_v25  ;;  %v593_v24 = vld [vmem:[#allocation5 + $0xf38] sm:$0xff]  ;;  %v610_v25 = vld [vmem:[#allocation5 + $0xfc0] sm:$0xff] }
  0xee   :  { %1109 = vmatpush.msra.mxu0 %v494_v26  ;;  %1128 = vmatpush.msra.mxu1 %v511_v27  ;;  %v560_v26 = vld [vmem:[#allocation5 + $0xe30] sm:$0xff]  ;;  %v577_v27 = vld [vmem:[#allocation5 + $0xeb8] sm:$0xff] }
  0xef   :  { %1149 = vmatpush.msra.mxu2 %v526_v28  ;;  %1168 = vmatpush.msra.mxu3 %v543_v29  ;;  %v592_v28 = vld [vmem:[#allocation5 + $0xf30] sm:$0xff]  ;;  %v609_v29 = vld [vmem:[#allocation5 + $0xfb8] sm:$0xff] }
  0xf0   :  { %1110 = vmatpush.msra.mxu0 %v493_v30  ;;  %1129 = vmatpush.msra.mxu1 %v510_v31  ;;  %v559_v30 = vld [vmem:[#allocation5 + $0xe28] sm:$0xff]  ;;  %v576_v31 = vld [vmem:[#allocation5 + $0xeb0] sm:$0xff] }
  0xf1   :  { %1150 = vmatpush.msra.mxu2 %v525_v32  ;;  %1169 = vmatpush.msra.mxu3 %v542_v33  ;;  %v591_v32 = vld [vmem:[#allocation5 + $0xf28] sm:$0xff]  ;;  %v608_v33 = vld [vmem:[#allocation5 + $0xfb0] sm:$0xff] }
  0xf2   :  { %1111 = vmatpush.msra.mxu0 %v492_v34  ;;  %1130 = vmatpush.msra.mxu1 %v509_v35  ;;  %v558_v34 = vld [vmem:[#allocation5 + $0xe20] sm:$0xff]  ;;  %v575_v35 = vld [vmem:[#allocation5 + $0xea8] sm:$0xff] }
  0xf3   :  { %1151 = vmatpush.msra.mxu2 %v524_v36  ;;  %1170 = vmatpush.msra.mxu3 %v541_v37  ;;  %v590_v36 = vld [vmem:[#allocation5 + $0xf20] sm:$0xff]  ;;  %v607_v37 = vld [vmem:[#allocation5 + $0xfa8] sm:$0xff] }
  0xf4   :  { %1112 = vmatpush.msra.mxu0 %v491_v38  ;;  %1131 = vmatpush.msra.mxu1 %v508_v39  ;;  %v557_v38 = vld [vmem:[#allocation5 + $0xe18] sm:$0xff]  ;;  %v574_v39 = vld [vmem:[#allocation5 + $0xea0] sm:$0xff] }
  0xf5   :  { %1152 = vmatpush.msra.mxu2 %v523_v42  ;;  %1171 = vmatpush.msra.mxu3 %v540_v43  ;;  %v556_v42 = vld [vmem:[#allocation5 + $0xe10] sm:$0xff]  ;;  %v573_v43 = vld [vmem:[#allocation5 + $0xe98] sm:$0xff] }
  0xf6   :  { %1113 = vmatpush.msra.mxu0 %v490_v44  ;;  %1132 = vmatpush.msra.mxu1 %v507_v45  ;;  %v588_v44 = vld [vmem:[#allocation5 + $0xf10] sm:$0xff]  ;;  %v605_v45 = vld [vmem:[#allocation5 + $0xf98] sm:$0xff] }
  0xf7   :  { %1153 = vmatpush.msra.mxu2 %v522_v46  ;;  %1172 = vmatpush.msra.mxu3 %v539_v47  ;;  %v555_v46 = vld [vmem:[#allocation5 + $0xe08] sm:$0xff]  ;;  %v572_v47 = vld [vmem:[#allocation5 + $0xe90] sm:$0xff] }
  0xf8   :  { %1114 = vmatmul.f32.vlgmr.msra.gmra.mxu0 %v98_v48  ;;  %1154 = vmatmul.f32.vlgmr.msra.gmra.mxu2 %v100_v49  ;;  %v70_v48 = vld [vmem:[#allocation2 + $0xe0] sm:$0xff]  ;;  %v72_v49 = vld [vmem:[#allocation2 + $0xf0] sm:$0xff] }
  0xf9   :  { %1178 = vmatpush.msrb.mxu0 %v569_v52  ;;  %1218 = vmatpush.msrb.mxu2 %v601_v53  ;;  %v554_v52 = vld [vmem:[#allocation5 + $0xe00] sm:$0xff]  ;;  %v571_v53 = vld [vmem:[#allocation5 + $0xe88] sm:$0xff] }
  0xfa   :  { %1133 = vmatpush.msra.mxu1 %v506_v54  ;;  %1173 = vmatpush.msra.mxu3 %v538_v55  ;;  %v71_v54 = vld [vmem:[#allocation2 + $0xe8] sm:$0xff]  ;;  %v73_v55 = vld [vmem:[#allocation2 + $0xf8] sm:$0xff] }
  0xfb   :  { %1134 = vmatmul.f32.vlgmr.msra.gmra.mxu1 %v99_v56  ;;  %1174 = vmatmul.f32.vlgmr.msra.gmra.mxu3 %v101_v57  ;;  %v586_v56 = vld [vmem:[#allocation5 + $0xf00] sm:$0xff]  ;;  %v603_v57 = vld [vmem:[#allocation5 + $0xf88] sm:$0xff] }
  0xfc   :  { %1179 = vmatpush.msrb.mxu0 %v568_v58  ;;  %1198 = vmatpush.msrb.mxu1 %v585_v59  ;;  %v102_v58 = vmul.f32 %v70_v48, %v70_v48  ;;  %v104_v59 = vmul.f32 %v72_v49, %v72_v49 }
  0xfd   :  { %1219 = vmatpush.msrb.mxu2 %v600_v60  ;;  %1238 = vmatpush.msrb.mxu3 %v617_v61  ;;  %v570_v60 = vld [vmem:[#allocation5 + $0xe80] sm:$0xff] }
  0xfe   :  { %1180 = vmatpush.msrb.mxu0 %v567_v62  ;;  %1199 = vmatpush.msrb.mxu1 %v584_v63  ;;  %v602_v61 = vld [vmem:[#allocation5 + $0xf80] sm:$0xff]  ;;  %v103_v62 = vmul.f32 %v71_v54, %v71_v54  ;;  %v105_v63 = vmul.f32 %v73_v55, %v73_v55 }
  0xff   :  { %1220 = vmatpush.msrb.mxu2 %v599_v0  ;;  %1239 = vmatpush.msrb.mxu3 %v616_v1  ;;  %v655_v0 = vpop.f32.mrf.mxu1  ;;  %v635_v1 = vpop.f32.mrf.mxu0 }
 0x100   :  { %1181 = vmatpush.msrb.mxu0 %v566_v2  ;;  %1200 = vmatpush.msrb.mxu1 %v583_v3  ;;  %v656_v2 = vadd.f32 %v655_v0, %v635_v1  ;;  %v675_v3 = vpop.f32.mrf.mxu2 }
 0x101   :  { %1221 = vmatpush.msrb.mxu2 %v598_v4  ;;  %1240 = vmatpush.msrb.mxu3 %v615_v5  ;;  %v695_v5 = vpop.f32.mrf.mxu3 }
 0x102   :  { %1182 = vmatpush.msrb.mxu0 %v565_v6  ;;  %1201 = vmatpush.msrb.mxu1 %v582_v7  ;;  %v676_v4 = vadd.f32 %v675_v3, %v656_v2 }
 0x103   :  { %1222 = vmatpush.msrb.mxu2 %v597_v8  ;;  %1241 = vmatpush.msrb.mxu3 %v614_v9 }
 0x104   :  { %1183 = vmatpush.msrb.mxu0 %v564_v10  ;;  %1202 = vmatpush.msrb.mxu1 %v581_v11  ;;  %v696_v6 = vadd.f32 %v695_v5, %v676_v4 }
 0x105   :  { %1223 = vmatpush.msrb.mxu2 %v596_v12  ;;  %1242 = vmatpush.msrb.mxu3 %v613_v13 }
 0x106   :  { %1184 = vmatpush.msrb.mxu0 %v563_v14  ;;  %1203 = vmatpush.msrb.mxu1 %v580_v15 }
 0x107   :  { %1224 = vmatpush.msrb.mxu2 %v595_v16  ;;  %1243 = vmatpush.msrb.mxu3 %v612_v17  ;;  %v715_v7 = vpop.f32.mrf.mxu0  ;;  %v735_v9 = vpop.f32.mrf.mxu1 }
 0x108   :  { %1185 = vmatpush.msrb.mxu0 %v562_v18  ;;  %1204 = vmatpush.msrb.mxu1 %v579_v19  ;;  %v716_v8 = vadd.f32 %v715_v7, %v696_v6  ;;  %v755_v11 = vpop.f32.mrf.mxu2 }
 0x109   :  { %1225 = vmatpush.msrb.mxu2 %v594_v20  ;;  %1244 = vmatpush.msrb.mxu3 %v611_v21  ;;  %v775_v13 = vpop.f32.mrf.mxu3 }
 0x10a   :  { %1186 = vmatpush.msrb.mxu0 %v561_v22  ;;  %1205 = vmatpush.msrb.mxu1 %v578_v23  ;;  %v736_v10 = vadd.f32 %v735_v9, %v716_v8 }
 0x10b   :  { %1226 = vmatpush.msrb.mxu2 %v593_v24  ;;  %1245 = vmatpush.msrb.mxu3 %v610_v25 }
 0x10c   :  { %1187 = vmatpush.msrb.mxu0 %v560_v26  ;;  %1206 = vmatpush.msrb.mxu1 %v577_v27  ;;  %v756_v12 = vadd.f32 %v755_v11, %v736_v10 }
 0x10d   :  { %1227 = vmatpush.msrb.mxu2 %v592_v28  ;;  %1246 = vmatpush.msrb.mxu3 %v609_v29 }
 0x10e   :  { %1188 = vmatpush.msrb.mxu0 %v559_v30  ;;  %1207 = vmatpush.msrb.mxu1 %v576_v31  ;;  %v776_v15 = vadd.f32 %v775_v13, %v756_v12 }
 0x10f   :  { %1228 = vmatpush.msrb.mxu2 %v591_v32  ;;  %1247 = vmatpush.msrb.mxu3 %v608_v33  ;;  %v795_v14 = vpop.f32.mrf.mxu0  ;;  %v815_v17 = vpop.f32.mrf.mxu1 }
 0x110   :  { %1189 = vmatpush.msrb.mxu0 %v558_v34  ;;  %1208 = vmatpush.msrb.mxu1 %v575_v35  ;;  %v796_v16 = vadd.f32 %v795_v14, %v776_v15  ;;  %v835_v18 = vpop.f32.mrf.mxu2 }
 0x111   :  { %1229 = vmatpush.msrb.mxu2 %v590_v36  ;;  %1248 = vmatpush.msrb.mxu3 %v607_v37  ;;  %v855_v21 = vpop.f32.mrf.mxu3 }
 0x112   :  { %1190 = vmatpush.msrb.mxu0 %v557_v38  ;;  %1209 = vmatpush.msrb.mxu1 %v574_v39  ;;  %v816_v19 = vadd.f32 %v815_v17, %v796_v16 }
 0x113   :  { %1230 = vmatpush.msrb.mxu2 %v589_v40  ;;  %1249 = vmatpush.msrb.mxu3 %v606_v41 }
 0x114   :  { %1191 = vmatpush.msrb.mxu0 %v556_v42  ;;  %1210 = vmatpush.msrb.mxu1 %v573_v43  ;;  %v836_v20 = vadd.f32 %v835_v18, %v816_v19 }
 0x115   :  { %1231 = vmatpush.msrb.mxu2 %v588_v44  ;;  %1250 = vmatpush.msrb.mxu3 %v605_v45 }
 0x116   :  { %1192 = vmatpush.msrb.mxu0 %v555_v46  ;;  %1211 = vmatpush.msrb.mxu1 %v572_v47  ;;  %v856_v23 = vadd.f32 %v855_v21, %v836_v20 }
 0x117   :  { %1232 = vmatpush.msrb.mxu2 %v587_v50  ;;  %1251 = vmatpush.msrb.mxu3 %v604_v51  ;;  %v875_v22 = vpop.f32.mrf.mxu0  ;;  %v895_v25 = vpop.f32.mrf.mxu1 }
 0x118   :  { %1193 = vmatpush.msrb.mxu0 %v554_v52  ;;  %1212 = vmatpush.msrb.mxu1 %v571_v53  ;;  %v876_v24 = vadd.f32 %v875_v22, %v856_v23  ;;  %v915_v26 = vpop.f32.mrf.mxu2 }
 0x119   :  { %1233 = vmatpush.msrb.mxu2 %v586_v56  ;;  %1252 = vmatpush.msrb.mxu3 %v603_v57  ;;  %v935_v29 = vpop.f32.mrf.mxu3 }
 0x11a   :  { %1194 = vmatmul.f32.vlgmr.msrb.gmra.mxu0 %v102_v58  ;;  %1234 = vmatmul.f32.vlgmr.msrb.gmra.mxu2 %v104_v59  ;;  %v896_v27 = vadd.f32 %v895_v25, %v876_v24 }
 0x11b   :  { %1213 = vmatpush.msrb.mxu1 %v570_v60  ;;  %1253 = vmatpush.msrb.mxu3 %v602_v61 }
 0x11c   :  { %1214 = vmatmul.f32.vlgmr.msrb.gmra.mxu1 %v103_v62  ;;  %1254 = vmatmul.f32.vlgmr.msrb.gmra.mxu3 %v105_v63  ;;  %v916_v28 = vadd.f32 %v915_v26, %v896_v27 }
 0x11e   :  { %v936_v31 = vadd.f32 %v935_v29, %v916_v28 }
 0x131   :  { %v955_v30 = vpop.f32.mrf.mxu0 }
 0x132   :  { %v956_v32 = vadd.f32 %v955_v30, %v936_v31 }
 0x134   :  { %v975_v33 = vpop.f32.mrf.mxu1 }
 0x135   :  { %v976_v35 = vadd.f32 %v975_v33, %v956_v32 }
 0x137   :  { %v995_v34 = vpop.f32.mrf.mxu2 }
 0x138   :  { %v996_v36 = vadd.f32 %v995_v34, %v976_v35 }
 0x13a   :  { %v1015_v37 = vpop.f32.mrf.mxu3 }
 0x13b   :  { %v1016_v39 = vadd.f32 %v1015_v37, %v996_v36 }
 0x153   :  { %v1035_v38 = vpop.f32.mrf.mxu0 }
 0x154   :  { %v1036_v40 = vadd.f32 %v1035_v38, %v1016_v39 }
 0x156   :  { %v1055_v41 = vpop.f32.mrf.mxu1 }
 0x157   :  { %v1056_v43 = vadd.f32 %v1055_v41, %v1036_v40 }
 0x159   :  { %v1075_v42 = vpop.f32.mrf.mxu2 }
 0x15a   :  { %v1076_v44 = vadd.f32 %v1075_v42, %v1056_v43 }
 0x15c   :  { %v1095_v45 = vpop.f32.mrf.mxu3 }
 0x15d   :  { %v1096_v47 = vadd.f32 %v1095_v45, %v1076_v44 }
 0x175   :  { %v1115_v46 = vpop.f32.mrf.mxu0 }
 0x176   :  { %v1116_v48 = vadd.f32 %v1115_v46, %v1096_v47 }
 0x178   :  { %v1135_v49 = vpop.f32.mrf.mxu1 }
 0x179   :  { %v1136_v51 = vadd.f32 %v1135_v49, %v1116_v48 }
 0x17b   :  { %v1155_v50 = vpop.f32.mrf.mxu2 }
 0x17c   :  { %v1156_v52 = vadd.f32 %v1155_v50, %v1136_v51 }
 0x17e   :  { %v1175_v53 = vpop.f32.mrf.mxu3 }
 0x17f   :  { %v1176_v54 = vadd.f32 %v1175_v53, %v1156_v52 }
 0x197   :  { %v1195_v55 = vpop.f32.mrf.mxu0 }
 0x198   :  { %v1196_v56 = vadd.f32 %v1195_v55, %v1176_v54 }
 0x199   :  { %v1215_v57 = vpop.f32.mrf.mxu1 }
 0x19a   :  { %v1216_v58 = vadd.f32 %v1215_v57, %v1196_v56 }
 0x19d   :  { %v1235_v59 = vpop.f32.mrf.mxu2 }
 0x19e   :  { %v1236_v60 = vadd.f32 %v1235_v59, %v1216_v58 }
 0x19f   :  { %v1255_v61 = vpop.f32.mrf.mxu3 }
 0x1a0   :  { %v1256_v62 = vadd.f32 %v1255_v61, %v1236_v60 }
 0x1a2   :  { %1258 = vst [vmem:[#allocation7] sm:$0xff] %v1256_v62 }
 0x1a3   :  { %1269 = dma.vmem_to_hbm [thread:$0]  %s1265_s1, 128, %s1267_s23, [#allocation4]  }
 0x1a4   :  { %1358 = dma.done.wait [#allocation4], 128  }
 0x1a5   :  { %1359 = vsyncadd [#allocation4], 4294967168 }
 0x1a6   :  { %1274 = vsyncpa [#allocation3], 1 }
 0x1a7   :  { %1275 = vsyncpa [#allocation6], 1 }
 0x1a8   :  { %1276 = vsyncpa [#allocation4], 1 }

</bundles_post_ra>
